<compile_context>
chip_gen: v6e
topology: v6e:2x2x1
jax: 0.10.0
libtpu: 0.0.40
codegen_flags: <defaults>
</compile_context>

<pallas_src>
import functools

import jax
import jax.numpy as jnp
from jax import lax
from jax.experimental import pallas as pl
from jax.experimental.pallas import tpu as pltpu

EPS = 1e-5
_VMEM_LIMIT = 64 * 1024 * 1024   # explicit scoped-VMEM budget (<= physical on v5e/v6e/v7x)
_MXU_MIN_CIN = 32                # below this the 1x1 conv runs on the VPU, not the MXU


def _pick_spatial_tile(m, cap=2048):
    """Largest lane-dense tile (multiple of 128) that evenly divides m, capped."""
    if m <= cap:
        return m
    t = (cap // 128) * 128
    while t >= 128:
        if m % t == 0:
            return t
        t -= 128
    return m


# --------------------------------------------------------------------------
# Pass 1: depthwise 3x3 conv + bias (per batch sample) + BN1 batch statistics
# --------------------------------------------------------------------------
def _dw_stats_kernel(stride, ho, wo, count, eps,
                     x_ref, dw_ref, db_ref, g_ref, b_ref,
                     h_ref, scale_ref, shift_ref,
                     xpad_ref, sum_ref, sq_ref):
    step = pl.program_id(0)
    cin, hh, ww = x_ref.shape

    @pl.when(step == 0)
    def _init():
        xpad_ref[...] = jnp.zeros_like(xpad_ref)   # zero border persists across steps
        sum_ref[...] = jnp.zeros_like(sum_ref)
        sq_ref[...] = jnp.zeros_like(sq_ref)

    # in-kernel zero padding: only the interior is rewritten each grid step
    xpad_ref[:, 1:hh + 1, 1:ww + 1] = x_ref[...].astype(jnp.float32)
    xp = xpad_ref[...]                                # (cin, H+2, W+2)
    dw = dw_ref[...].astype(jnp.float32)              # (cin, 3, 3)
    db = db_ref[...].astype(jnp.float32)              # (cin, 1)

    hs = (ho - 1) * stride + 1
    ws = (wo - 1) * stride + 1
    acc = None
    for di in range(3):
        for dj in range(3):
            # TODO(synk): for stride=2 deinterleave even/odd W planes once and use
            # pltpu.roll for the dj offsets instead of per-tap strided slices.
            tap = xp[:, di:di + hs:stride, dj:dj + ws:stride]   # (cin, ho, wo)
            w = dw[:, di:di + 1, dj:dj + 1]                     # (cin, 1, 1)
            acc = tap * w if acc is None else acc + tap * w

    # scatter rows into the lane-dense (cin, ho*wo) output block (+ conv bias)
    # TODO(synk): for large feature maps compute per-row inside lax.fori_loop
    # (3-row input window) to bound vreg live ranges instead of whole-sample acc.
    for r in range(ho):
        h_ref[:, r * wo:(r + 1) * wo] = acc[:, r, :] + db

    h2 = h_ref[...]                                   # (cin, ho*wo), f32
    sum_ref[...] += jnp.sum(h2, axis=1, keepdims=True)
    sq_ref[...] += jnp.sum(h2 * h2, axis=1, keepdims=True)

    @pl.when(step == pl.num_programs(0) - 1)
    def _finalize():
        inv = 1.0 / count
        mean = sum_ref[...] * inv
        var = jnp.maximum(sq_ref[...] * inv - mean * mean, 0.0)
        scale = g_ref[...] * lax.rsqrt(var + eps)
        scale_ref[...] = scale
        shift_ref[...] = b_ref[...] - mean * scale


# --------------------------------------------------------------------------
# Pass 2: apply BN1 + ReLU, pointwise 1x1 conv + bias, BN2 batch statistics
# --------------------------------------------------------------------------
def _pw_stats_kernel(count, eps,
                     h_ref, s1_ref, t1_ref, pw_ref, pb_ref, g_ref, b_ref,
                     z_ref, scale_ref, shift_ref,
                     sum_ref, sq_ref):
    i = pl.program_id(0)
    j = pl.program_id(1)
    first = jnp.logical_and(i == 0, j == 0)
    last = jnp.logical_and(i == pl.num_programs(0) - 1,
                           j == pl.num_programs(1) - 1)

    @pl.when(first)
    def _init():
        sum_ref[...] = jnp.zeros_like(sum_ref)
        sq_ref[...] = jnp.zeros_like(sq_ref)

    # BN1 apply + ReLU (f32)
    a = jnp.maximum(h_ref[...] * s1_ref[...] + t1_ref[...], 0.0)   # (cin, tm)
    pw = pw_ref[...]                                               # (cout, cin)
    cin = a.shape[0]
    if cin >= _MXU_MIN_CIN:
        # large-channel path: bf16 MXU operands, f32 accumulation
        z = jnp.dot(pw.astype(jnp.bfloat16), a.astype(jnp.bfloat16),
                    preferred_element_type=jnp.float32)
    else:
        # tiny-channel path (test case cin=4): VPU broadcast-MAC, skip the MXU
        z = pw[:, 0:1] * a[0:1, :]
        for c in range(1, cin):
            z = z + pw[:, c:c + 1] * a[c:c + 1, :]
    z = z + pb_ref[...]                                            # (cout, tm)

    sum_ref[...] += jnp.sum(z, axis=1, keepdims=True)
    sq_ref[...] += jnp.sum(z * z, axis=1, keepdims=True)
    z_ref[...] = z

    @pl.when(last)
    def _finalize():
        inv = 1.0 / count
        mean = sum_ref[...] * inv
        var = jnp.maximum(sq_ref[...] * inv - mean * mean, 0.0)
        scale = g_ref[...] * lax.rsqrt(var + eps)
        scale_ref[...] = scale
        shift_ref[...] = b_ref[...] - mean * scale


# --------------------------------------------------------------------------
# Pass 3: apply BN2 + ReLU (pure element-wise -> fully parallel grid)
# --------------------------------------------------------------------------
def _bn_apply_kernel(z_ref, s_ref, t_ref, o_ref):
    o_ref[...] = jnp.maximum(z_ref[...] * s_ref[...] + t_ref[...], 0.0)


# --------------------------------------------------------------------------
# Parameters / wrapper / reference
# --------------------------------------------------------------------------
def mobile_block_init(key, in_features, out_features):
    ks = jax.random.split(key, 8)
    return dict(
        dw_weight=0.2 * jax.random.normal(ks[0], (in_features, 1, 3, 3), jnp.float32),
        dw_bias=0.1 * jax.random.normal(ks[1], (in_features,), jnp.float32),
        d_gamma=1.0 + 0.1 * jax.random.normal(ks[2], (in_features,), jnp.float32),
        d_beta=0.1 * jax.random.normal(ks[3], (in_features,), jnp.float32),
        pw_weight=0.2 * jax.random.normal(ks[4], (out_features, in_features, 1, 1), jnp.float32),
        pw_bias=0.1 * jax.random.normal(ks[5], (out_features,), jnp.float32),
        p_gamma=1.0 + 0.1 * jax.random.normal(ks[6], (out_features,), jnp.float32),
        p_beta=0.1 * jax.random.normal(ks[7], (out_features,), jnp.float32),
    )


def mobile_block_forward(x_nchw, params, stride=1):
    n, cin, h, w = x_nchw.shape
    cout = params["pw_weight"].shape[0]
    ho = (h + 2 - 3) // stride + 1
    wo = (w + 2 - 3) // stride + 1
    m = ho * wo
    tm = _pick_spatial_tile(m)
    mt = m // tm
    f32 = jnp.float32

    x = x_nchw.astype(f32)                               # stays NCHW (no transpose/pad op)
    dw = params["dw_weight"].reshape(cin, 3, 3).astype(f32)
    db = params["dw_bias"].reshape(cin, 1).astype(f32)
    dg = params["d_gamma"].reshape(cin, 1).astype(f32)
    dbt = params["d_beta"].reshape(cin, 1).astype(f32)
    pw = params["pw_weight"].reshape(cout, cin).astype(f32)
    pb = params["pw_bias"].reshape(cout, 1).astype(f32)
    pg = params["p_gamma"].reshape(cout, 1).astype(f32)
    pbt = params["p_beta"].reshape(cout, 1).astype(f32)
    count = float(n * m)

    # ---- pass 1: depthwise conv + bias, BN1 stats ----
    cost1 = pl.CostEstimate(flops=int(n * cin * m * 20),
                            transcendentals=int(cin),
                            bytes_accessed=int(4 * (n * cin * h * w + n * cin * m)))
    h_act, s1, t1 = pl.pallas_call(
        functools.partial(_dw_stats_kernel, stride, ho, wo, count, EPS),
        out_shape=(jax.ShapeDtypeStruct((n, cin, m), f32),
                   jax.ShapeDtypeStruct((cin, 1), f32),
                   jax.ShapeDtypeStruct((cin, 1), f32)),
        grid_spec=pltpu.PrefetchScalarGridSpec(
            num_scalar_prefetch=0,
            grid=(n,),
            in_specs=[
                pl.BlockSpec((None, cin, h, w), lambda i: (i, 0, 0, 0)),
                pl.BlockSpec((cin, 3, 3), lambda i: (0, 0, 0)),
                pl.BlockSpec((cin, 1), lambda i: (0, 0)),
                pl.BlockSpec((cin, 1), lambda i: (0, 0)),
                pl.BlockSpec((cin, 1), lambda i: (0, 0)),
            ],
            out_specs=(
                pl.BlockSpec((None, cin, m), lambda i: (i, 0, 0)),
                pl.BlockSpec((cin, 1), lambda i: (0, 0)),
                pl.BlockSpec((cin, 1), lambda i: (0, 0)),
            ),
            scratch_shapes=[
                pltpu.VMEM((cin, h + 2, w + 2), f32),   # padded-sample scratch
                pltpu.VMEM((cin, 1), f32),              # running sum
                pltpu.VMEM((cin, 1), f32),              # running sum of squares
            ]),
        compiler_params=pltpu.CompilerParams(
            dimension_semantics=("arbitrary",),          # sequential: exact batch stats
            vmem_limit_bytes=_VMEM_LIMIT),
        cost_estimate=cost1,
    )(x, dw, db, dg, dbt)

    # ---- pass 2: BN1 apply + ReLU + 1x1 conv + bias, BN2 stats ----
    cost2 = pl.CostEstimate(flops=int(n * m * (2 * cin * cout + 4 * cin + 4 * cout)),
                            transcendentals=int(cout),
                            bytes_accessed=int(4 * n * m * (cin + cout)))
    z_act, s2, t2 = pl.pallas_call(
        functools.partial(_pw_stats_kernel, count, EPS),
        out_shape=(jax.ShapeDtypeStruct((n, cout, m), f32),
                   jax.ShapeDtypeStruct((cout, 1), f32),
                   jax.ShapeDtypeStruct((cout, 1), f32)),
        grid_spec=pltpu.PrefetchScalarGridSpec(
            num_scalar_prefetch=0,
            grid=(n, mt),
            in_specs=[
                pl.BlockSpec((None, cin, tm), lambda i, j: (i, 0, j)),
                pl.BlockSpec((cin, 1), lambda i, j: (0, 0)),
                pl.BlockSpec((cin, 1), lambda i, j: (0, 0)),
                pl.BlockSpec((cout, cin), lambda i, j: (0, 0)),
                pl.BlockSpec((cout, 1), lambda i, j: (0, 0)),
                pl.BlockSpec((cout, 1), lambda i, j: (0, 0)),
                pl.BlockSpec((cout, 1), lambda i, j: (0, 0)),
            ],
            out_specs=(
                pl.BlockSpec((None, cout, tm), lambda i, j: (i, 0, j)),
                pl.BlockSpec((cout, 1), lambda i, j: (0, 0)),
                pl.BlockSpec((cout, 1), lambda i, j: (0, 0)),
            ),
            scratch_shapes=[
                pltpu.VMEM((cout, 1), f32),
                pltpu.VMEM((cout, 1), f32),
            ]),
        compiler_params=pltpu.CompilerParams(
            dimension_semantics=("arbitrary", "arbitrary"),
            vmem_limit_bytes=_VMEM_LIMIT),
        cost_estimate=cost2,
    )(h_act, s1, t1, pw, pb, pg, pbt)

    # ---- pass 3: BN2 apply + ReLU (megacore-parallel) ----
    cost3 = pl.CostEstimate(flops=int(3 * n * m * cout),
                            transcendentals=0,
                            bytes_accessed=int(8 * n * m * cout))
    out = pl.pallas_call(
        _bn_apply_kernel,
        out_shape=jax.ShapeDtypeStruct((n, cout, m), f32),
        grid_spec=pltpu.PrefetchScalarGridSpec(
            num_scalar_prefetch=0,
            grid=(n, mt),
            in_specs=[
                pl.BlockSpec((None, cout, tm), lambda i, j: (i, 0, j)),
                pl.BlockSpec((cout, 1), lambda i, j: (0, 0)),
                pl.BlockSpec((cout, 1), lambda i, j: (0, 0)),
            ],
            out_specs=pl.BlockSpec((None, cout, tm), lambda i, j: (i, 0, j)),
        ),
        compiler_params=pltpu.CompilerParams(
            dimension_semantics=("parallel", "parallel"),
            vmem_limit_bytes=_VMEM_LIMIT),
        cost_estimate=cost3,
    )(z_act, s2, t2)

    # contiguous metadata reshape back to NCHW; no transpose needed
    return out.reshape(n, cout, ho, wo)


def mobile_block_reference(x_nchw, params, stride=1):
    """Pure-JAX reference matching the PyTorch forward (training-mode BN)."""
    def bn(t, gamma, beta):
        mean = jnp.mean(t, axis=(0, 2, 3), keepdims=True)
        var = jnp.mean((t - mean) ** 2, axis=(0, 2, 3), keepdims=True)
        return ((t - mean) / jnp.sqrt(var + EPS)
                * gamma[None, :, None, None] + beta[None, :, None, None])

    y = lax.conv_general_dilated(
        x_nchw, params["dw_weight"], (stride, stride), ((1, 1), (1, 1)),
        feature_group_count=x_nchw.shape[1],
        dimension_numbers=("NCHW", "OIHW", "NCHW"))
    y = y + params["dw_bias"][None, :, None, None]
    y = jnp.maximum(bn(y, params["d_gamma"], params["d_beta"]), 0.0)

    z = lax.conv_general_dilated(
        y, params["pw_weight"], (1, 1), ((0, 0), (0, 0)),
        dimension_numbers=("NCHW", "OIHW", "NCHW"))
    z = z + params["pw_bias"][None, :, None, None]
    z = jnp.maximum(bn(z, params["p_gamma"], params["p_beta"]), 0.0)
    return z


if __name__ == "__main__":
    key = jax.random.PRNGKey(0)
    k_x, k_p = jax.random.split(key)

    N, C_IN, C_OUT, H, W, STRIDE = 2, 4, 8, 16, 16, 1
    x = jax.random.normal(k_x, (N, C_IN, H, W), jnp.float32)
    params = mobile_block_init(k_p, C_IN, C_OUT)

    out = jax.block_until_ready(mobile_block_forward(x, params, stride=STRIDE))
    ref = jax.block_until_ready(mobile_block_reference(x, params, stride=STRIDE))

    assert out.shape == ref.shape == (N, C_OUT, H // STRIDE, W // STRIDE)
    err = float(jnp.max(jnp.abs(out - ref)))
    assert jnp.allclose(out, ref, atol=1e-3, rtol=1e-3), err
    print("KERNEL_OK")
</pallas_src>

<mosaic_0001>
module attributes {stable_mosaic.version = 11 : i64} {
  func.func @_dw_stats_kernel(%arg0: i32, %arg1: memref<1x4x16x16xf32, #tpu.memory_space<vmem>>, %arg2: memref<4x3x3xf32, #tpu.memory_space<vmem>>, %arg3: memref<4x1xf32, #tpu.memory_space<vmem>>, %arg4: memref<4x1xf32, #tpu.memory_space<vmem>>, %arg5: memref<4x1xf32, #tpu.memory_space<vmem>>, %arg6: memref<1x4x256xf32, #tpu.memory_space<vmem>>, %arg7: memref<4x1xf32, #tpu.memory_space<vmem>>, %arg8: memref<4x1xf32, #tpu.memory_space<vmem>>, %arg9: memref<4x18x18xf32, #tpu.memory_space<vmem>>, %arg10: memref<4x1xf32, #tpu.memory_space<vmem>>, %arg11: memref<4x1xf32, #tpu.memory_space<vmem>>) attributes {dimension_semantics = [#tpu.dimension_semantics<arbitrary>], iteration_bounds = array<i64: 2>, scalar_prefetch = 0 : i64, scratch_operands = 3 : i64, tpu.core_type = #tpu.core_type<tc>, window_params = [{transform_indices = @transform_0, window_bounds = array<i64: 1, 4, 16, 16>}, {pipeline_mode = #tpu.pipeline_mode<synchronous>, transform_indices = @transform_1, window_bounds = array<i64: 4, 3, 3>}, {pipeline_mode = #tpu.pipeline_mode<synchronous>, transform_indices = @transform_2, window_bounds = array<i64: 4, 1>}, {pipeline_mode = #tpu.pipeline_mode<synchronous>, transform_indices = @transform_3, window_bounds = array<i64: 4, 1>}, {pipeline_mode = #tpu.pipeline_mode<synchronous>, transform_indices = @transform_4, window_bounds = array<i64: 4, 1>}, {transform_indices = @transform_5, window_bounds = array<i64: 1, 4, 256>}, {pipeline_mode = #tpu.pipeline_mode<synchronous>, transform_indices = @transform_6, window_bounds = array<i64: 4, 1>}, {pipeline_mode = #tpu.pipeline_mode<synchronous>, transform_indices = @transform_7, window_bounds = array<i64: 4, 1>}]} {
    %c0_i32 = arith.constant 0 : i32
    %0 = arith.cmpi eq, %arg0, %c0_i32 : i32
    %1 = arith.extui %0 : i1 to i32
    %c0_i32_0 = arith.constant 0 : i32
    %2 = arith.cmpi ne, %1, %c0_i32_0 : i32
    scf.if %2 {
      %cst_60 = arith.constant 0.000000e+00 : f32
      %181 = vector.broadcast %cst_60 : f32 to vector<4x18x18xf32>
      %c0_61 = arith.constant 0 : index
      %c0_62 = arith.constant 0 : index
      %c0_63 = arith.constant 0 : index
      %182 = vector.load %arg9[%c0_61, %c0_62, %c0_63] : memref<4x18x18xf32, #tpu.memory_space<vmem>>, vector<4x18x18xf32>
      tpu.vector_store %arg9[%c0_61, %c0_62, %c0_63], %181 {strides = array<i32>} : memref<4x18x18xf32, #tpu.memory_space<vmem>>, vector<4x18x18xf32>,
      %cst_64 = arith.constant 0.000000e+00 : f32
      %183 = vector.broadcast %cst_64 : f32 to vector<4x1xf32>
      %c0_65 = arith.constant 0 : index
      %c0_66 = arith.constant 0 : index
      %184 = vector.load %arg10[%c0_65, %c0_66] : memref<4x1xf32, #tpu.memory_space<vmem>>, vector<4x1xf32>
      tpu.vector_store %arg10[%c0_65, %c0_66], %183 {strides = array<i32>} : memref<4x1xf32, #tpu.memory_space<vmem>>, vector<4x1xf32>,
      %cst_67 = arith.constant 0.000000e+00 : f32
      %185 = vector.broadcast %cst_67 : f32 to vector<4x1xf32>
      %c0_68 = arith.constant 0 : index
      %c0_69 = arith.constant 0 : index
      %186 = vector.load %arg11[%c0_68, %c0_69] : memref<4x1xf32, #tpu.memory_space<vmem>>, vector<4x1xf32>
      tpu.vector_store %arg11[%c0_68, %c0_69], %185 {strides = array<i32>} : memref<4x1xf32, #tpu.memory_space<vmem>>, vector<4x1xf32>,
    } else {
    }
    %c0 = arith.constant 0 : index
    %c0_1 = arith.constant 0 : index
    %c0_2 = arith.constant 0 : index
    %c0_3 = arith.constant 0 : index
    %3 = vector.load %arg1[%c0, %c0_1, %c0_2, %c0_3] : memref<1x4x16x16xf32, #tpu.memory_space<vmem>>, vector<1x4x16x16xf32>
    %4 = vector.shape_cast %3 : vector<1x4x16x16xf32> to vector<4x16x16xf32>
    %c0_4 = arith.constant 0 : index
    %c1 = arith.constant 1 : index
    %c1_5 = arith.constant 1 : index
    %5 = vector.load %arg9[%c0_4, %c1, %c1_5] : memref<4x18x18xf32, #tpu.memory_space<vmem>>, vector<4x16x16xf32>
    tpu.vector_store %arg9[%c0_4, %c1, %c1_5], %4 {strides = array<i32>} : memref<4x18x18xf32, #tpu.memory_space<vmem>>, vector<4x16x16xf32>,
    %c0_6 = arith.constant 0 : index
    %c0_7 = arith.constant 0 : index
    %c0_8 = arith.constant 0 : index
    %6 = vector.load %arg9[%c0_6, %c0_7, %c0_8] : memref<4x18x18xf32, #tpu.memory_space<vmem>>, vector<4x18x18xf32>
    %c0_9 = arith.constant 0 : index
    %c0_10 = arith.constant 0 : index
    %c0_11 = arith.constant 0 : index
    %7 = vector.load %arg2[%c0_9, %c0_10, %c0_11] : memref<4x3x3xf32, #tpu.memory_space<vmem>>, vector<4x3x3xf32>
    %c0_12 = arith.constant 0 : index
    %c0_13 = arith.constant 0 : index
    %8 = vector.load %arg3[%c0_12, %c0_13] : memref<4x1xf32, #tpu.memory_space<vmem>>, vector<4x1xf32>
    %9 = vector.extract_strided_slice %6 {offsets = [0, 0, 0], sizes = [4, 16, 16], strides = [1, 1, 1]} : vector<4x18x18xf32> to vector<4x16x16xf32>
    %10 = vector.extract_strided_slice %7 {offsets = [0, 0, 0], sizes = [4, 1, 1], strides = [1, 1, 1]} : vector<4x3x3xf32> to vector<4x1x1xf32>
    %11 = vector.broadcast %10 : vector<4x1x1xf32> to vector<4x16x16xf32>
    %12 = arith.mulf %9, %11 : vector<4x16x16xf32>
    %13 = vector.extract_strided_slice %6 {offsets = [0, 0, 1], sizes = [4, 16, 16], strides = [1, 1, 1]} : vector<4x18x18xf32> to vector<4x16x16xf32>
    %14 = vector.extract_strided_slice %7 {offsets = [0, 0, 1], sizes = [4, 1, 1], strides = [1, 1, 1]} : vector<4x3x3xf32> to vector<4x1x1xf32>
    %15 = vector.broadcast %14 : vector<4x1x1xf32> to vector<4x16x16xf32>
    %16 = arith.mulf %13, %15 : vector<4x16x16xf32>
    %17 = arith.addf %12, %16 : vector<4x16x16xf32>
    %18 = vector.extract_strided_slice %6 {offsets = [0, 0, 2], sizes = [4, 16, 16], strides = [1, 1, 1]} : vector<4x18x18xf32> to vector<4x16x16xf32>
    %19 = vector.extract_strided_slice %7 {offsets = [0, 0, 2], sizes = [4, 1, 1], strides = [1, 1, 1]} : vector<4x3x3xf32> to vector<4x1x1xf32>
    %20 = vector.broadcast %19 : vector<4x1x1xf32> to vector<4x16x16xf32>
    %21 = arith.mulf %18, %20 : vector<4x16x16xf32>
    %22 = arith.addf %17, %21 : vector<4x16x16xf32>
    %23 = vector.extract_strided_slice %6 {offsets = [0, 1, 0], sizes = [4, 16, 16], strides = [1, 1, 1]} : vector<4x18x18xf32> to vector<4x16x16xf32>
    %24 = vector.extract_strided_slice %7 {offsets = [0, 1, 0], sizes = [4, 1, 1], strides = [1, 1, 1]} : vector<4x3x3xf32> to vector<4x1x1xf32>
    %25 = vector.broadcast %24 : vector<4x1x1xf32> to vector<4x16x16xf32>
    %26 = arith.mulf %23, %25 : vector<4x16x16xf32>
    %27 = arith.addf %22, %26 : vector<4x16x16xf32>
    %28 = vector.extract_strided_slice %6 {offsets = [0, 1, 1], sizes = [4, 16, 16], strides = [1, 1, 1]} : vector<4x18x18xf32> to vector<4x16x16xf32>
    %29 = vector.extract_strided_slice %7 {offsets = [0, 1, 1], sizes = [4, 1, 1], strides = [1, 1, 1]} : vector<4x3x3xf32> to vector<4x1x1xf32>
    %30 = vector.broadcast %29 : vector<4x1x1xf32> to vector<4x16x16xf32>
    %31 = arith.mulf %28, %30 : vector<4x16x16xf32>
    %32 = arith.addf %27, %31 : vector<4x16x16xf32>
    %33 = vector.extract_strided_slice %6 {offsets = [0, 1, 2], sizes = [4, 16, 16], strides = [1, 1, 1]} : vector<4x18x18xf32> to vector<4x16x16xf32>
    %34 = vector.extract_strided_slice %7 {offsets = [0, 1, 2], sizes = [4, 1, 1], strides = [1, 1, 1]} : vector<4x3x3xf32> to vector<4x1x1xf32>
    %35 = vector.broadcast %34 : vector<4x1x1xf32> to vector<4x16x16xf32>
    %36 = arith.mulf %33, %35 : vector<4x16x16xf32>
    %37 = arith.addf %32, %36 : vector<4x16x16xf32>
    %38 = vector.extract_strided_slice %6 {offsets = [0, 2, 0], sizes = [4, 16, 16], strides = [1, 1, 1]} : vector<4x18x18xf32> to vector<4x16x16xf32>
    %39 = vector.extract_strided_slice %7 {offsets = [0, 2, 0], sizes = [4, 1, 1], strides = [1, 1, 1]} : vector<4x3x3xf32> to vector<4x1x1xf32>
    %40 = vector.broadcast %39 : vector<4x1x1xf32> to vector<4x16x16xf32>
    %41 = arith.mulf %38, %40 : vector<4x16x16xf32>
    %42 = arith.addf %37, %41 : vector<4x16x16xf32>
    %43 = vector.extract_strided_slice %6 {offsets = [0, 2, 1], sizes = [4, 16, 16], strides = [1, 1, 1]} : vector<4x18x18xf32> to vector<4x16x16xf32>
    %44 = vector.extract_strided_slice %7 {offsets = [0, 2, 1], sizes = [4, 1, 1], strides = [1, 1, 1]} : vector<4x3x3xf32> to vector<4x1x1xf32>
    %45 = vector.broadcast %44 : vector<4x1x1xf32> to vector<4x16x16xf32>
    %46 = arith.mulf %43, %45 : vector<4x16x16xf32>
    %47 = arith.addf %42, %46 : vector<4x16x16xf32>
    %48 = vector.extract_strided_slice %6 {offsets = [0, 2, 2], sizes = [4, 16, 16], strides = [1, 1, 1]} : vector<4x18x18xf32> to vector<4x16x16xf32>
    %49 = vector.extract_strided_slice %7 {offsets = [0, 2, 2], sizes = [4, 1, 1], strides = [1, 1, 1]} : vector<4x3x3xf32> to vector<4x1x1xf32>
    %50 = vector.broadcast %49 : vector<4x1x1xf32> to vector<4x16x16xf32>
    %51 = arith.mulf %48, %50 : vector<4x16x16xf32>
    %52 = arith.addf %47, %51 : vector<4x16x16xf32>
    %53 = vector.extract_strided_slice %52 {offsets = [0, 0, 0], sizes = [4, 1, 16], strides = [1, 1, 1]} : vector<4x16x16xf32> to vector<4x1x16xf32>
    %54 = vector.shape_cast %53 : vector<4x1x16xf32> to vector<4x16xf32>
    %55 = vector.broadcast %8 : vector<4x1xf32> to vector<4x16xf32>
    %56 = arith.addf %54, %55 : vector<4x16xf32>
    %c0_14 = arith.constant 0 : index
    %c0_15 = arith.constant 0 : index
    %c0_16 = arith.constant 0 : index
    %57 = vector.load %arg6[%c0_14, %c0_15, %c0_16] : memref<1x4x256xf32, #tpu.memory_space<vmem>>, vector<1x4x16xf32>
    %58 = vector.shape_cast %57 : vector<1x4x16xf32> to vector<4x16xf32>
    %59 = vector.shape_cast %56 : vector<4x16xf32> to vector<1x4x16xf32>
    tpu.vector_store %arg6[%c0_14, %c0_15, %c0_16], %59 {strides = array<i32>} : memref<1x4x256xf32, #tpu.memory_space<vmem>>, vector<1x4x16xf32>,
    %60 = vector.extract_strided_slice %52 {offsets = [0, 1, 0], sizes = [4, 1, 16], strides = [1, 1, 1]} : vector<4x16x16xf32> to vector<4x1x16xf32>
    %61 = vector.shape_cast %60 : vector<4x1x16xf32> to vector<4x16xf32>
    %62 = vector.broadcast %8 : vector<4x1xf32> to vector<4x16xf32>
    %63 = arith.addf %61, %62 : vector<4x16xf32>
    %c0_17 = arith.constant 0 : index
    %c0_18 = arith.constant 0 : index
    %c16 = arith.constant 16 : index
    %64 = vector.load %arg6[%c0_17, %c0_18, %c16] : memref<1x4x256xf32, #tpu.memory_space<vmem>>, vector<1x4x16xf32>
    %65 = vector.shape_cast %64 : vector<1x4x16xf32> to vector<4x16xf32>
    %66 = vector.shape_cast %63 : vector<4x16xf32> to vector<1x4x16xf32>
    tpu.vector_store %arg6[%c0_17, %c0_18, %c16], %66 {strides = array<i32>} : memref<1x4x256xf32, #tpu.memory_space<vmem>>, vector<1x4x16xf32>,
    %67 = vector.extract_strided_slice %52 {offsets = [0, 2, 0], sizes = [4, 1, 16], strides = [1, 1, 1]} : vector<4x16x16xf32> to vector<4x1x16xf32>
    %68 = vector.shape_cast %67 : vector<4x1x16xf32> to vector<4x16xf32>
    %69 = vector.broadcast %8 : vector<4x1xf32> to vector<4x16xf32>
    %70 = arith.addf %68, %69 : vector<4x16xf32>
    %c0_19 = arith.constant 0 : index
    %c0_20 = arith.constant 0 : index
    %c32 = arith.constant 32 : index
    %71 = vector.load %arg6[%c0_19, %c0_20, %c32] : memref<1x4x256xf32, #tpu.memory_space<vmem>>, vector<1x4x16xf32>
    %72 = vector.shape_cast %71 : vector<1x4x16xf32> to vector<4x16xf32>
    %73 = vector.shape_cast %70 : vector<4x16xf32> to vector<1x4x16xf32>
    tpu.vector_store %arg6[%c0_19, %c0_20, %c32], %73 {strides = array<i32>} : memref<1x4x256xf32, #tpu.memory_space<vmem>>, vector<1x4x16xf32>,
    %74 = vector.extract_strided_slice %52 {offsets = [0, 3, 0], sizes = [4, 1, 16], strides = [1, 1, 1]} : vector<4x16x16xf32> to vector<4x1x16xf32>
    %75 = vector.shape_cast %74 : vector<4x1x16xf32> to vector<4x16xf32>
    %76 = vector.broadcast %8 : vector<4x1xf32> to vector<4x16xf32>
    %77 = arith.addf %75, %76 : vector<4x16xf32>
    %c0_21 = arith.constant 0 : index
    %c0_22 = arith.constant 0 : index
    %c48 = arith.constant 48 : index
    %78 = vector.load %arg6[%c0_21, %c0_22, %c48] : memref<1x4x256xf32, #tpu.memory_space<vmem>>, vector<1x4x16xf32>
    %79 = vector.shape_cast %78 : vector<1x4x16xf32> to vector<4x16xf32>
    %80 = vector.shape_cast %77 : vector<4x16xf32> to vector<1x4x16xf32>
    tpu.vector_store %arg6[%c0_21, %c0_22, %c48], %80 {strides = array<i32>} : memref<1x4x256xf32, #tpu.memory_space<vmem>>, vector<1x4x16xf32>,
    %81 = vector.extract_strided_slice %52 {offsets = [0, 4, 0], sizes = [4, 1, 16], strides = [1, 1, 1]} : vector<4x16x16xf32> to vector<4x1x16xf32>
    %82 = vector.shape_cast %81 : vector<4x1x16xf32> to vector<4x16xf32>
    %83 = vector.broadcast %8 : vector<4x1xf32> to vector<4x16xf32>
    %84 = arith.addf %82, %83 : vector<4x16xf32>
    %c0_23 = arith.constant 0 : index
    %c0_24 = arith.constant 0 : index
    %c64 = arith.constant 64 : index
    %85 = vector.load %arg6[%c0_23, %c0_24, %c64] : memref<1x4x256xf32, #tpu.memory_space<vmem>>, vector<1x4x16xf32>
    %86 = vector.shape_cast %85 : vector<1x4x16xf32> to vector<4x16xf32>
    %87 = vector.shape_cast %84 : vector<4x16xf32> to vector<1x4x16xf32>
    tpu.vector_store %arg6[%c0_23, %c0_24, %c64], %87 {strides = array<i32>} : memref<1x4x256xf32, #tpu.memory_space<vmem>>, vector<1x4x16xf32>,
    %88 = vector.extract_strided_slice %52 {offsets = [0, 5, 0], sizes = [4, 1, 16], strides = [1, 1, 1]} : vector<4x16x16xf32> to vector<4x1x16xf32>
    %89 = vector.shape_cast %88 : vector<4x1x16xf32> to vector<4x16xf32>
    %90 = vector.broadcast %8 : vector<4x1xf32> to vector<4x16xf32>
    %91 = arith.addf %89, %90 : vector<4x16xf32>
    %c0_25 = arith.constant 0 : index
    %c0_26 = arith.constant 0 : index
    %c80 = arith.constant 80 : index
    %92 = vector.load %arg6[%c0_25, %c0_26, %c80] : memref<1x4x256xf32, #tpu.memory_space<vmem>>, vector<1x4x16xf32>
    %93 = vector.shape_cast %92 : vector<1x4x16xf32> to vector<4x16xf32>
    %94 = vector.shape_cast %91 : vector<4x16xf32> to vector<1x4x16xf32>
    tpu.vector_store %arg6[%c0_25, %c0_26, %c80], %94 {strides = array<i32>} : memref<1x4x256xf32, #tpu.memory_space<vmem>>, vector<1x4x16xf32>,
    %95 = vector.extract_strided_slice %52 {offsets = [0, 6, 0], sizes = [4, 1, 16], strides = [1, 1, 1]} : vector<4x16x16xf32> to vector<4x1x16xf32>
    %96 = vector.shape_cast %95 : vector<4x1x16xf32> to vector<4x16xf32>
    %97 = vector.broadcast %8 : vector<4x1xf32> to vector<4x16xf32>
    %98 = arith.addf %96, %97 : vector<4x16xf32>
    %c0_27 = arith.constant 0 : index
    %c0_28 = arith.constant 0 : index
    %c96 = arith.constant 96 : index
    %99 = vector.load %arg6[%c0_27, %c0_28, %c96] : memref<1x4x256xf32, #tpu.memory_space<vmem>>, vector<1x4x16xf32>
    %100 = vector.shape_cast %99 : vector<1x4x16xf32> to vector<4x16xf32>
    %101 = vector.shape_cast %98 : vector<4x16xf32> to vector<1x4x16xf32>
    tpu.vector_store %arg6[%c0_27, %c0_28, %c96], %101 {strides = array<i32>} : memref<1x4x256xf32, #tpu.memory_space<vmem>>, vector<1x4x16xf32>,
    %102 = vector.extract_strided_slice %52 {offsets = [0, 7, 0], sizes = [4, 1, 16], strides = [1, 1, 1]} : vector<4x16x16xf32> to vector<4x1x16xf32>
    %103 = vector.shape_cast %102 : vector<4x1x16xf32> to vector<4x16xf32>
    %104 = vector.broadcast %8 : vector<4x1xf32> to vector<4x16xf32>
    %105 = arith.addf %103, %104 : vector<4x16xf32>
    %c0_29 = arith.constant 0 : index
    %c0_30 = arith.constant 0 : index
    %c112 = arith.constant 112 : index
    %106 = vector.load %arg6[%c0_29, %c0_30, %c112] : memref<1x4x256xf32, #tpu.memory_space<vmem>>, vector<1x4x16xf32>
    %107 = vector.shape_cast %106 : vector<1x4x16xf32> to vector<4x16xf32>
    %108 = vector.shape_cast %105 : vector<4x16xf32> to vector<1x4x16xf32>
    tpu.vector_store %arg6[%c0_29, %c0_30, %c112], %108 {strides = array<i32>} : memref<1x4x256xf32, #tpu.memory_space<vmem>>, vector<1x4x16xf32>,
    %109 = vector.extract_strided_slice %52 {offsets = [0, 8, 0], sizes = [4, 1, 16], strides = [1, 1, 1]} : vector<4x16x16xf32> to vector<4x1x16xf32>
    %110 = vector.shape_cast %109 : vector<4x1x16xf32> to vector<4x16xf32>
    %111 = vector.broadcast %8 : vector<4x1xf32> to vector<4x16xf32>
    %112 = arith.addf %110, %111 : vector<4x16xf32>
    %c0_31 = arith.constant 0 : index
    %c0_32 = arith.constant 0 : index
    %c128 = arith.constant 128 : index
    %113 = vector.load %arg6[%c0_31, %c0_32, %c128] : memref<1x4x256xf32, #tpu.memory_space<vmem>>, vector<1x4x16xf32>
    %114 = vector.shape_cast %113 : vector<1x4x16xf32> to vector<4x16xf32>
    %115 = vector.shape_cast %112 : vector<4x16xf32> to vector<1x4x16xf32>
    tpu.vector_store %arg6[%c0_31, %c0_32, %c128], %115 {strides = array<i32>} : memref<1x4x256xf32, #tpu.memory_space<vmem>>, vector<1x4x16xf32>,
    %116 = vector.extract_strided_slice %52 {offsets = [0, 9, 0], sizes = [4, 1, 16], strides = [1, 1, 1]} : vector<4x16x16xf32> to vector<4x1x16xf32>
    %117 = vector.shape_cast %116 : vector<4x1x16xf32> to vector<4x16xf32>
    %118 = vector.broadcast %8 : vector<4x1xf32> to vector<4x16xf32>
    %119 = arith.addf %117, %118 : vector<4x16xf32>
    %c0_33 = arith.constant 0 : index
    %c0_34 = arith.constant 0 : index
    %c144 = arith.constant 144 : index
    %120 = vector.load %arg6[%c0_33, %c0_34, %c144] : memref<1x4x256xf32, #tpu.memory_space<vmem>>, vector<1x4x16xf32>
    %121 = vector.shape_cast %120 : vector<1x4x16xf32> to vector<4x16xf32>
    %122 = vector.shape_cast %119 : vector<4x16xf32> to vector<1x4x16xf32>
    tpu.vector_store %arg6[%c0_33, %c0_34, %c144], %122 {strides = array<i32>} : memref<1x4x256xf32, #tpu.memory_space<vmem>>, vector<1x4x16xf32>,
    %123 = vector.extract_strided_slice %52 {offsets = [0, 10, 0], sizes = [4, 1, 16], strides = [1, 1, 1]} : vector<4x16x16xf32> to vector<4x1x16xf32>
    %124 = vector.shape_cast %123 : vector<4x1x16xf32> to vector<4x16xf32>
    %125 = vector.broadcast %8 : vector<4x1xf32> to vector<4x16xf32>
    %126 = arith.addf %124, %125 : vector<4x16xf32>
    %c0_35 = arith.constant 0 : index
    %c0_36 = arith.constant 0 : index
    %c160 = arith.constant 160 : index
    %127 = vector.load %arg6[%c0_35, %c0_36, %c160] : memref<1x4x256xf32, #tpu.memory_space<vmem>>, vector<1x4x16xf32>
    %128 = vector.shape_cast %127 : vector<1x4x16xf32> to vector<4x16xf32>
    %129 = vector.shape_cast %126 : vector<4x16xf32> to vector<1x4x16xf32>
    tpu.vector_store %arg6[%c0_35, %c0_36, %c160], %129 {strides = array<i32>} : memref<1x4x256xf32, #tpu.memory_space<vmem>>, vector<1x4x16xf32>,
    %130 = vector.extract_strided_slice %52 {offsets = [0, 11, 0], sizes = [4, 1, 16], strides = [1, 1, 1]} : vector<4x16x16xf32> to vector<4x1x16xf32>
    %131 = vector.shape_cast %130 : vector<4x1x16xf32> to vector<4x16xf32>
    %132 = vector.broadcast %8 : vector<4x1xf32> to vector<4x16xf32>
    %133 = arith.addf %131, %132 : vector<4x16xf32>
    %c0_37 = arith.constant 0 : index
    %c0_38 = arith.constant 0 : index
    %c176 = arith.constant 176 : index
    %134 = vector.load %arg6[%c0_37, %c0_38, %c176] : memref<1x4x256xf32, #tpu.memory_space<vmem>>, vector<1x4x16xf32>
    %135 = vector.shape_cast %134 : vector<1x4x16xf32> to vector<4x16xf32>
    %136 = vector.shape_cast %133 : vector<4x16xf32> to vector<1x4x16xf32>
    tpu.vector_store %arg6[%c0_37, %c0_38, %c176], %136 {strides = array<i32>} : memref<1x4x256xf32, #tpu.memory_space<vmem>>, vector<1x4x16xf32>,
    %137 = vector.extract_strided_slice %52 {offsets = [0, 12, 0], sizes = [4, 1, 16], strides = [1, 1, 1]} : vector<4x16x16xf32> to vector<4x1x16xf32>
    %138 = vector.shape_cast %137 : vector<4x1x16xf32> to vector<4x16xf32>
    %139 = vector.broadcast %8 : vector<4x1xf32> to vector<4x16xf32>
    %140 = arith.addf %138, %139 : vector<4x16xf32>
    %c0_39 = arith.constant 0 : index
    %c0_40 = arith.constant 0 : index
    %c192 = arith.constant 192 : index
    %141 = vector.load %arg6[%c0_39, %c0_40, %c192] : memref<1x4x256xf32, #tpu.memory_space<vmem>>, vector<1x4x16xf32>
    %142 = vector.shape_cast %141 : vector<1x4x16xf32> to vector<4x16xf32>
    %143 = vector.shape_cast %140 : vector<4x16xf32> to vector<1x4x16xf32>
    tpu.vector_store %arg6[%c0_39, %c0_40, %c192], %143 {strides = array<i32>} : memref<1x4x256xf32, #tpu.memory_space<vmem>>, vector<1x4x16xf32>,
    %144 = vector.extract_strided_slice %52 {offsets = [0, 13, 0], sizes = [4, 1, 16], strides = [1, 1, 1]} : vector<4x16x16xf32> to vector<4x1x16xf32>
    %145 = vector.shape_cast %144 : vector<4x1x16xf32> to vector<4x16xf32>
    %146 = vector.broadcast %8 : vector<4x1xf32> to vector<4x16xf32>
    %147 = arith.addf %145, %146 : vector<4x16xf32>
    %c0_41 = arith.constant 0 : index
    %c0_42 = arith.constant 0 : index
    %c208 = arith.constant 208 : index
    %148 = vector.load %arg6[%c0_41, %c0_42, %c208] : memref<1x4x256xf32, #tpu.memory_space<vmem>>, vector<1x4x16xf32>
    %149 = vector.shape_cast %148 : vector<1x4x16xf32> to vector<4x16xf32>
    %150 = vector.shape_cast %147 : vector<4x16xf32> to vector<1x4x16xf32>
    tpu.vector_store %arg6[%c0_41, %c0_42, %c208], %150 {strides = array<i32>} : memref<1x4x256xf32, #tpu.memory_space<vmem>>, vector<1x4x16xf32>,
    %151 = vector.extract_strided_slice %52 {offsets = [0, 14, 0], sizes = [4, 1, 16], strides = [1, 1, 1]} : vector<4x16x16xf32> to vector<4x1x16xf32>
    %152 = vector.shape_cast %151 : vector<4x1x16xf32> to vector<4x16xf32>
    %153 = vector.broadcast %8 : vector<4x1xf32> to vector<4x16xf32>
    %154 = arith.addf %152, %153 : vector<4x16xf32>
    %c0_43 = arith.constant 0 : index
    %c0_44 = arith.constant 0 : index
    %c224 = arith.constant 224 : index
    %155 = vector.load %arg6[%c0_43, %c0_44, %c224] : memref<1x4x256xf32, #tpu.memory_space<vmem>>, vector<1x4x16xf32>
    %156 = vector.shape_cast %155 : vector<1x4x16xf32> to vector<4x16xf32>
    %157 = vector.shape_cast %154 : vector<4x16xf32> to vector<1x4x16xf32>
    tpu.vector_store %arg6[%c0_43, %c0_44, %c224], %157 {strides = array<i32>} : memref<1x4x256xf32, #tpu.memory_space<vmem>>, vector<1x4x16xf32>,
    %158 = vector.extract_strided_slice %52 {offsets = [0, 15, 0], sizes = [4, 1, 16], strides = [1, 1, 1]} : vector<4x16x16xf32> to vector<4x1x16xf32>
    %159 = vector.shape_cast %158 : vector<4x1x16xf32> to vector<4x16xf32>
    %160 = vector.broadcast %8 : vector<4x1xf32> to vector<4x16xf32>
    %161 = arith.addf %159, %160 : vector<4x16xf32>
    %c0_45 = arith.constant 0 : index
    %c0_46 = arith.constant 0 : index
    %c240 = arith.constant 240 : index
    %162 = vector.load %arg6[%c0_45, %c0_46, %c240] : memref<1x4x256xf32, #tpu.memory_space<vmem>>, vector<1x4x16xf32>
    %163 = vector.shape_cast %162 : vector<1x4x16xf32> to vector<4x16xf32>
    %164 = vector.shape_cast %161 : vector<4x16xf32> to vector<1x4x16xf32>
    tpu.vector_store %arg6[%c0_45, %c0_46, %c240], %164 {strides = array<i32>} : memref<1x4x256xf32, #tpu.memory_space<vmem>>, vector<1x4x16xf32>,
    %c0_47 = arith.constant 0 : index
    %c0_48 = arith.constant 0 : index
    %c0_49 = arith.constant 0 : index
    %165 = vector.load %arg6[%c0_47, %c0_48, %c0_49] : memref<1x4x256xf32, #tpu.memory_space<vmem>>, vector<1x4x256xf32>
    %166 = vector.shape_cast %165 : vector<1x4x256xf32> to vector<4x256xf32>
    %c0_50 = arith.constant 0 : index
    %c0_51 = arith.constant 0 : index
    %167 = vector.load %arg10[%c0_50, %c0_51] : memref<4x1xf32, #tpu.memory_space<vmem>>, vector<4x1xf32>
    %cst = arith.constant dense<0.000000e+00> : vector<4xf32>
    %168 = vector.multi_reduction <add>, %166, %cst [1] : vector<4x256xf32> to vector<4xf32>
    %169 = vector.shape_cast %168 : vector<4xf32> to vector<4x1xf32>
    %170 = arith.addf %167, %169 : vector<4x1xf32>
    %c0_52 = arith.constant 0 : index
    %c0_53 = arith.constant 0 : index
    %171 = vector.load %arg10[%c0_52, %c0_53] : memref<4x1xf32, #tpu.memory_space<vmem>>, vector<4x1xf32>
    tpu.vector_store %arg10[%c0_52, %c0_53], %170 {strides = array<i32>} : memref<4x1xf32, #tpu.memory_space<vmem>>, vector<4x1xf32>,
    %c0_54 = arith.constant 0 : index
    %c0_55 = arith.constant 0 : index
    %172 = vector.load %arg11[%c0_54, %c0_55] : memref<4x1xf32, #tpu.memory_space<vmem>>, vector<4x1xf32>
    %173 = arith.mulf %166, %166 : vector<4x256xf32>
    %cst_56 = arith.constant dense<0.000000e+00> : vector<4xf32>
    %174 = vector.multi_reduction <add>, %173, %cst_56 [1] : vector<4x256xf32> to vector<4xf32>
    %175 = vector.shape_cast %174 : vector<4xf32> to vector<4x1xf32>
    %176 = arith.addf %172, %175 : vector<4x1xf32>
    %c0_57 = arith.constant 0 : index
    %c0_58 = arith.constant 0 : index
    %177 = vector.load %arg11[%c0_57, %c0_58] : memref<4x1xf32, #tpu.memory_space<vmem>>, vector<4x1xf32>
    tpu.vector_store %arg11[%c0_57, %c0_58], %176 {strides = array<i32>} : memref<4x1xf32, #tpu.memory_space<vmem>>, vector<4x1xf32>,
    %c1_i32 = arith.constant 1 : i32
    %178 = arith.cmpi eq, %arg0, %c1_i32 : i32
    %179 = arith.extui %178 : i1 to i32
    %c0_i32_59 = arith.constant 0 : i32
    %180 = arith.cmpi ne, %179, %c0_i32_59 : i32
    scf.if %180 {
      %c0_60 = arith.constant 0 : index
      %c0_61 = arith.constant 0 : index
      %181 = vector.load %arg10[%c0_60, %c0_61] : memref<4x1xf32, #tpu.memory_space<vmem>>, vector<4x1xf32>
      %cst_62 = arith.constant 0.001953125 : f32
      %182 = vector.broadcast %cst_62 : f32 to vector<4x1xf32>
      %183 = arith.mulf %181, %182 : vector<4x1xf32>
      %c0_63 = arith.constant 0 : index
      %c0_64 = arith.constant 0 : index
      %184 = vector.load %arg11[%c0_63, %c0_64] : memref<4x1xf32, #tpu.memory_space<vmem>>, vector<4x1xf32>
      %cst_65 = arith.constant 0.001953125 : f32
      %185 = vector.broadcast %cst_65 : f32 to vector<4x1xf32>
      %186 = arith.mulf %184, %185 : vector<4x1xf32>
      %187 = arith.mulf %183, %183 : vector<4x1xf32>
      %188 = arith.subf %186, %187 : vector<4x1xf32>
      %cst_66 = arith.constant 0.000000e+00 : f32
      %189 = vector.broadcast %cst_66 : f32 to vector<4x1xf32>
      %190 = arith.maximumf %188, %189 : vector<4x1xf32>
      %c0_67 = arith.constant 0 : index
      %c0_68 = arith.constant 0 : index
      %191 = vector.load %arg4[%c0_67, %c0_68] : memref<4x1xf32, #tpu.memory_space<vmem>>, vector<4x1xf32>
      %cst_69 = arith.constant 9.99999974E-6 : f32
      %192 = vector.broadcast %cst_69 : f32 to vector<4x1xf32>
      %193 = arith.addf %190, %192 : vector<4x1xf32>
      %194 = math.rsqrt %193 : vector<4x1xf32>
      %195 = arith.mulf %191, %194 : vector<4x1xf32>
      %c0_70 = arith.constant 0 : index
      %c0_71 = arith.constant 0 : index
      %196 = vector.load %arg7[%c0_70, %c0_71] : memref<4x1xf32, #tpu.memory_space<vmem>>, vector<4x1xf32>
      tpu.vector_store %arg7[%c0_70, %c0_71], %195 {strides = array<i32>} : memref<4x1xf32, #tpu.memory_space<vmem>>, vector<4x1xf32>,
      %c0_72 = arith.constant 0 : index
      %c0_73 = arith.constant 0 : index
      %197 = vector.load %arg5[%c0_72, %c0_73] : memref<4x1xf32, #tpu.memory_space<vmem>>, vector<4x1xf32>
      %198 = arith.mulf %183, %195 : vector<4x1xf32>
      %199 = arith.subf %197, %198 : vector<4x1xf32>
      %c0_74 = arith.constant 0 : index
      %c0_75 = arith.constant 0 : index
      %200 = vector.load %arg8[%c0_74, %c0_75] : memref<4x1xf32, #tpu.memory_space<vmem>>, vector<4x1xf32>
      tpu.vector_store %arg8[%c0_74, %c0_75], %199 {strides = array<i32>} : memref<4x1xf32, #tpu.memory_space<vmem>>, vector<4x1xf32>,
    } else {
    }
    return
  }
  func.func @transform_0(%arg0: i32) -> (i32, i32, i32, i32) {
    %c0_i32 = arith.constant 0 : i32
    %c0_i32_0 = arith.constant 0 : i32
    %c0_i32_1 = arith.constant 0 : i32
    %c0_i32_2 = arith.constant 0 : i32
    return %arg0, %c0_i32, %c0_i32_0, %c0_i32_1 : i32, i32, i32, i32
  }
  func.func @transform_1(%arg0: i32) -> (i32, i32, i32) {
    %c0_i32 = arith.constant 0 : i32
    %c0_i32_0 = arith.constant 0 : i32
    %c0_i32_1 = arith.constant 0 : i32
    %c0_i32_2 = arith.constant 0 : i32
    return %c0_i32, %c0_i32_0, %c0_i32_1 : i32, i32, i32
  }
  func.func @transform_2(%arg0: i32) -> (i32, i32) {
    %c0_i32 = arith.constant 0 : i32
    %c0_i32_0 = arith.constant 0 : i32
    %c0_i32_1 = arith.constant 0 : i32
    return %c0_i32, %c0_i32_0 : i32, i32
  }
  func.func @transform_3(%arg0: i32) -> (i32, i32) {
    %c0_i32 = arith.constant 0 : i32
    %c0_i32_0 = arith.constant 0 : i32
    %c0_i32_1 = arith.constant 0 : i32
    return %c0_i32, %c0_i32_0 : i32, i32
  }
  func.func @transform_4(%arg0: i32) -> (i32, i32) {
    %c0_i32 = arith.constant 0 : i32
    %c0_i32_0 = arith.constant 0 : i32
    %c0_i32_1 = arith.constant 0 : i32
    return %c0_i32, %c0_i32_0 : i32, i32
  }
  func.func @transform_5(%arg0: i32) -> (i32, i32, i32) {
    %c0_i32 = arith.constant 0 : i32
    %c0_i32_0 = arith.constant 0 : i32
    %c0_i32_1 = arith.constant 0 : i32
    return %arg0, %c0_i32, %c0_i32_0 : i32, i32, i32
  }
  func.func @transform_6(%arg0: i32) -> (i32, i32) {
    %c0_i32 = arith.constant 0 : i32
    %c0_i32_0 = arith.constant 0 : i32
    %c0_i32_1 = arith.constant 0 : i32
    return %c0_i32, %c0_i32_0 : i32, i32
  }
  func.func @transform_7(%arg0: i32) -> (i32, i32) {
    %c0_i32 = arith.constant 0 : i32
    %c0_i32_0 = arith.constant 0 : i32
    %c0_i32_1 = arith.constant 0 : i32
    return %c0_i32, %c0_i32_0 : i32, i32
  }
}

</mosaic_0001>

<bundles_post_ra>
// kernel: tpu_custom_call.1
= control target key start
LH: loop header
LB: loop body
LE: loop exit
PB: predicated region body
PF: predicated region fallthrough
CT: control target
= control target key end

     0   :  { %s3181_s0 = inlined_call_operand.hbm [shape: f32[2,4,16,16], index: 0, kind: input, shape index: {}]   ;;  %s3182_s1 = inlined_call_operand.vmem [shape: f32[4,3,3], index: 1, kind: input, shape index: {}]   ;;  %s3183_s2 = inlined_call_operand.vmem [shape: f32[4,1], index: 2, kind: input, shape index: {}]   ;;  %s3184_s3 = inlined_call_operand.vmem [shape: f32[4,1], index: 3, kind: input, shape index: {}]   ;;  %s3185_s4 = inlined_call_operand.vmem [shape: f32[4,1], index: 4, kind: input, shape index: {}]   ;;  %s3186_s5 = inlined_call_operand.hbm [shape: f32[2,4,256], index: 5, kind: output, shape index: {0}]   ;;  %s3187_s6 = inlined_call_operand.vmem [shape: f32[4,1], index: 6, kind: output, shape index: {1}]   ;;  %s3188_s7 = inlined_call_operand.vmem [shape: f32[4,1], index: 7, kind: output, shape index: {2}]  }
   0x1   :  { %3216 = sst [smem:[#allocation34_spill]] %s3181_s0 }
   0x2   :  { %3217 = sst [smem:[#allocation35_spill]] %s3182_s1 }
   0x3   :  { %3218 = sst [smem:[#allocation36_spill]] %s3183_s2 }
   0x4   :  { %13 = vsyncpa [#allocation6], 0 }
   0x5   :  { %15 = vsyncpa [#allocation6 + $0x1], 0 }
   0x6   :  { %16 = vsyncpa [#allocation7], 0 }
   0x7   :  { %18 = vsyncpa [#allocation7 + $0x1], 0  ;;  %s1921_s24 = smov 0   ;;  %s1923_s25 = smov 0  }
   0x8   :  { %s1925_s26 = smov 0   ;;  %s1927_s27 = smov 0  }
   0x9 LB: > { %s1942_s28 = sadd.s32 4294967295, %s1863_s27   ;;  %s1617_s29 = sadd.s32 4294967294, %s1863_s27   ;;  %s1863_s27 = sphi %s1927_s27, %s3331_s27   ;;  %s1859_s26 = sphi %s1925_s26, %s3330_s26   ;;  %s1855_s25 = sphi %s1923_s25, %s3329_s25   ;;  %s1851_s24 = sphi %s1921_s24, %s3328_s24  }
   0xa   : > { %s1946_s30 = sadd.s32 1, %s1863_s27   ;;  %s31_s8 = sadd.s32 1, %s1859_s26 }
   0xb   : > { %s28_s9 = ssub.s32 %s1863_s27, %s1946_s30  ;;  %p38_p0 = scmp.ne.s32.totalorder %s1859_s26, %s1855_s25 }
   0xc   : > { %p29_p1 = scmp.eq.s32.totalorder %s28_s9, 0  ;;  %p39_p2 = scmp.eq.s32.totalorder %s1863_s27, 0 }
   0xd   : > { %p44_p3 = scmp.ne.s32.totalorder %s1855_s25, %s1851_s24  ;;  %p45_p4 = scmp.eq.s32.totalorder %s1942_s28, 0 }
   0xe   : > { %s1958_s10 = scalar_select %p29_p1, %s1859_s26, %s31_s8  }
   0xf   : > { %p1960_p5 = por %p39_p2, %p38_p0  ;;  %p1964_p6 = por %p45_p4, %p44_p3 }
  0x10   : > { %p152_p7 = scmp.eq.s32.totalorder %s1942_s28, 1  ;;  %p158_p8 = scmp.eq.s32.totalorder %s1617_s29, 1 }
  0x11   : > { %s3220_s12 = scalar_select %p1964_p6, 1, 0 }
  0x12   : > { %p1719_p10 = scmp.lt.s32.totalorder %s1863_s27, 2  ;;  %p1971_p11 = por %p152_p7, %p38_p0 }
  0x13   : > { %p1975_p12 = por %p158_p8, %p44_p3  ;;  %s232_s15 = sand.u32 1, %s1859_s26  }
  0x14   : > { %s3221_s13 = scalar_select %p1971_p11, 1, 0 }
  0x15   : > { %s3222_s14 = scalar_select %p1975_p12, 1, 0 }
  0x16   : > { %s1633_s16 = sshll.u32 %s1863_s27, 10  ;;  %s1620_s17 = sshll.u32 %s232_s15, 6 }
  0x17   : > { %s3223_s0 = sld [smem:[#allocation34_spill]]  ;;  %s236_s21 = scalar_lea.vmem [#allocation5], %s1620_s17 }
  0x18   : > { %s243_s22 = sshll.u32 %s236_s21, 4  ;;  %p1988_p13 = pnand %p1719_p10, %p1960_p5  ;;  %s1992_s22 = int_to_ptr.vmem [resolvable:$true] %s243_s22 }
  0x19   : > { %s1994_s29 = scalar_lea.sflag [#allocation6], %s232_s15 }
  0x1a   : > { %p1773_p1 = pneg %p1988_p13 }
  0x1d   : > { %s1984_s20 = scalar_lea.hbm %s3223_s0, %s1633_s16  ;;  %s1776_s17 = scalar_lea.hbm %s3223_s0, 2048 }
  0x1e   : > { %s1771_s8 = scalar_lea.hbm %s1984_s20, 1024  ;;  %p1777_p4 = scmp.lt.s32.totalorder %s1984_s20, %s3223_s0 }
  0x1f   : > { %p1772_p0 = scmp.ne.s32.totalorder %s1984_s20, %s1771_s8  ;;  %p1778_p5 = scmp.lt.s32.totalorder %s1776_s17, %s1771_s8 }
  0x21   : > { %p1774_p2 = pnand %p1773_p1, %p1772_p0  ;;  %p1779_p7 = por %p1778_p5, %p1777_p4 }
  0x23   : > { %p1775_p3 = pneg %p1774_p2 }
  0x25   : > { %p1780_p8 = pnand %p1779_p7, %p1775_p3 }
  0x27   : > { %1783 = shalt.err (!%p1780_p8)
}
  0x28   : > { %s1784_s15 = scalar_lea.vmem %s1992_s22, 1024  ;;  %s1865_s19 = smov [#allocation5]  }
  0x29   : > { %p1785_p10 = scmp.ne.s32.totalorder %s1992_s22, %s1784_s15  ;;  %s1789_s21 = sshll.u32 %s1865_s19, 4  ;;  %s1790_s21 = int_to_ptr.vmem [resolvable:$false] %s1789_s21 }
  0x2a   : > { %s1791_s9 = scalar_lea.vmem %s1790_s21, 2048  ;;  %p1792_p2 = scmp.lt.s32.totalorder %s1992_s22, %s1790_s21 }
  0x2b   : > { %p1787_p9 = pnand %p1785_p10, %p1773_p1  ;;  %p1793_p12 = scmp.lt.s32.totalorder %s1791_s9, %s1784_s15 }
  0x2d   : > { %p1788_p0 = pneg %p1787_p9  ;;  %p1794_p11 = por %p1793_p12, %p1792_p2 }
  0x2f   : > { %p1795_p6 = pnand %p1794_p11, %p1788_p0 }
  0x31   : > { %1798 = shalt.err (!%p1795_p6)
}
  0x32   : > { %s1866_s8 = smov 128   ;;  %s1867_s16 = smov 8  }
  0x33   : > { %1714 = dma.hbm_to_vmem [thread:$0]  (!%p1988_p13), %s1984_s20, 1024, %s1992_s22, %s1994_s29, %s1866_s8, %s1866_s8, %s1867_s16  }
  0x34   : > { %p1623_p9 = scmp.ge.s32.totalorder %s1863_s27, 1  ;;  %p251_p1 = scmp.lt.s32.totalorder %s1863_s27, 3 }
  0x36   : > { %p252_p3 = pnand %p1623_p9, %p251_p1 }
  0x38   : > { %255 = sbr.rel (%p252_p3) target bundleno = 856 (0x358), region = 40 }
  0x3d   : > { %s2018_s17 = sand.u32 1, %s1855_s25   ;;  %p3225_p6 = scmp.ne.s32.totalorder %s3220_s12, 0 }
  0x3e   : > { %s1624_s11 = sshll.u32 %s2018_s17, 6  ;;  %s258_s18 = scalar_lea.sflag [#allocation6], %s2018_s17 }
  0x3f   : > { %s2022_s15 = scalar_lea.vmem [#allocation5], %s1624_s11 }
  0x40   : > { %1842 = dma.done.wait (%p3225_p6), %s258_s18, 1024  }
  0x41   : > { %1844 = vsyncadd (%p3225_p6), %s258_s18, 4294966272  ;;  %s1625_s20 = sshll.u32 %s2018_s17, 3  ;;  %p1626_p11 = scmp.ne.s32.totalorder %s1942_s28, 0 }
  0x42   : > { %s2029_s22 = scalar_lea.vmem [#allocation8], %s1625_s20 }
  0x43   : > { %295 = sbr.rel (%p1626_p11) target bundleno = 80 (0x50), region = 48 }
  0x48   : > { %vm296_vm0 = vcmask 146432   ;;  %vm299_vm1 = vcmask 140288   ;;  %vm310_vm2 = vcmask 3072   ;;  %v1868_v0 = vmov 0.0  }
  0x49   : > { %297 = vst.msk [vmem:[#allocation2] sm:$0xff] %vm296_vm0, %v1868_v0  ;;  %298 = vst.msk [vmem:[#allocation2 + $0x8] sm:$0xff] %vm296_vm0, %v1868_v0 }
  0x4a   : > { %301 = vst.msk [vmem:[#allocation2 + $0x18] sm:$0xff] %vm296_vm0, %v1868_v0  ;;  %302 = vst.msk [vmem:[#allocation2 + $0x20] sm:$0xff] %vm296_vm0, %v1868_v0 }
  0x4b   : > { %304 = vst.msk [vmem:[#allocation2 + $0x30] sm:$0xff] %vm296_vm0, %v1868_v0  ;;  %305 = vst.msk [vmem:[#allocation2 + $0x38] sm:$0xff] %vm296_vm0, %v1868_v0 }
  0x4c   : > { %307 = vst.msk [vmem:[#allocation2 + $0x48] sm:$0xff] %vm296_vm0, %v1868_v0  ;;  %308 = vst.msk [vmem:[#allocation2 + $0x50] sm:$0xff] %vm296_vm0, %v1868_v0 }
  0x4d   : > { %300 = vst.msk [vmem:[#allocation2 + $0x10] sm:$0x3] %vm299_vm1, %v1868_v0  ;;  %303 = vst.msk [vmem:[#allocation2 + $0x28] sm:$0x3] %vm299_vm1, %v1868_v0 }
  0x4e   : > { %306 = vst.msk [vmem:[#allocation2 + $0x40] sm:$0x3] %vm299_vm1, %v1868_v0  ;;  %309 = vst.msk [vmem:[#allocation2 + $0x58] sm:$0x3] %vm299_vm1, %v1868_v0 }
  0x4f   : > { %311 = vst.msk [vmem:[#allocation3] sm:$0xf] %vm310_vm2, %v1868_v0  ;;  %312 = vst.msk [vmem:[#allocation4] sm:$0xf] %vm310_vm2, %v1868_v0 }
  0x50 PF: > { %s3226_s1 = sld [smem:[#allocation35_spill]]  ;;  %s3191_s21 = smov 127   ;;  %v1871_v11 = vmov 0   ;;  %v314_v14 = vld [vmem:[%s2022_s15 + $0x8] sm:$0xff]  ;;  %v313_v15 = vld [vmem:[%s2022_s15] sm:$0xff]  ;;  %v316_v16 = vld [vmem:[%s2022_s15 + $0x18] sm:$0xff] }
  0x51   : > { %s1870_s18 = smov 126   ;;  %1767 = vset.pattern.permute.xlu0 %v1871_v11  ;;  %s1872_s20 = smov 1   ;;  %v315_v17 = vld [vmem:[%s2022_s15 + $0x10] sm:$0xff]  ;;  %v318_v18 = vld [vmem:[%s2022_s15 + $0x28] sm:$0xff]  ;;  %v317_v19 = vld [vmem:[%s2022_s15 + $0x20] sm:$0xff]  ;;  %vm353_vm3 = vcmask 138248  }
  0x52   : > { %v320_v20 = vld [vmem:[%s2022_s15 + $0x38] sm:$0xff]  ;;  %v319_v21 = vld [vmem:[%s2022_s15 + $0x30] sm:$0xff]  ;;  %s3227_s2 = sld [smem:[#allocation36_spill]]  ;;  %vm579_vm4 = vcmask 1046528   ;;  %vm848_vm5 = vcmask 1045504   ;;  %vm1097_vm6 = vcmask 1041409  }
  0x53   : > { %vm1099_vm7 = vcmask 1045509   ;;  %vm1102_vm8 = vcmask 1042434   ;;  %vm1104_vm9 = vcmask 1046534   ;;  %vm1107_vm10 = vcmask 1043459   ;;  %p1627_p12 = scmp.ne.s32.totalorder %s1942_s28, 1 }
  0x54   : > { %vm1109_vm11 = vcmask 1047559   ;;  %vm1112_vm12 = vcmask 125952   ;;  %vm1136_vm13 = vcmask 257152   ;;  %vm1160_vm14 = vcmask 388352  }
  0x55   : > { %vm1184_vm15 = vcmask 519552   ;;  %vm1212_vm0 = vcmask 650752   ;;  %vm1238_vm1 = vcmask 781952   ;;  %vm1264_vm2 = vcmask 913152  }
  0x56   : > { %v376_v1 = vld [vmem:[%s3226_s1 + $0x8] sm:$0x7]  ;;  %v374_v2 = vld [vmem:[%s3226_s1] sm:$0x7]  ;;  %v375_v3 = vld [vmem:[%s3226_s1 + $0x4] sm:$0x7] }
  0x57   : > { %407 = vrot.lane.b32.xlu1 %v376_v1, %s3191_s21  ;;  %403 = vrot.lane.b32.xlu0 %v374_v2, %s3191_s21  ;;  %1635 = vpush %v374_v2  ;;  %v377_v4 = vld [vmem:[%s3226_s1 + $0xc] sm:$0x7]  ;;  %v540_v5 = vrot.slane %v375_v3, 1  ;;  %v539_v6 = vrot.slane %v374_v2, 1  ;;  %v541_v8 = vrot.slane %v376_v1, 1  ;;  %v2060_v9 = vrot.slane %v375_v3, 2 }
  0x58   : > { %1637 = vpush %v375_v3  ;;  %v542_v7 = vrot.slane %v377_v4, 1  ;;  %v2062_v10 = vrot.slane %v374_v2, 2  ;;  %v2068_v12 = vrot.slane %v377_v4, 2  ;;  %v2070_v13 = vrot.slane %v376_v1, 2  ;;  %v378_v22 = vld [vmem:[%s3227_s2] sm:$0xf] }
  0x59   : > { %1639 = vpush %v376_v1 }
  0x5a   : > { %1641 = vpush %v377_v4 }
  0x5b   : > { %409 = vrot.lane.b32.xlu1 %v377_v4, %s3191_s21  ;;  %405 = vrot.lane.b32.xlu0 %v375_v3, %s3191_s21 }
  0x5f   : > { %473 = vrot.lane.b32.xlu1 %v375_v3, %s1870_s18  ;;  %471 = vrot.lane.b32.xlu0 %v374_v2, %s1870_s18 }
  0x63   : > { %477 = vrot.lane.b32.xlu1 %v377_v4, %s1870_s18  ;;  %475 = vrot.lane.b32.xlu0 %v376_v1, %s1870_s18 }
  0x67   : > { %618 = vrot.lane.b32.xlu1 %v540_v5, %s3191_s21  ;;  %616 = vrot.lane.b32.xlu0 %v539_v6, %s3191_s21 }
  0x6b   : > { %622 = vrot.lane.b32.xlu1 %v542_v7, %s3191_s21  ;;  %620 = vrot.lane.b32.xlu0 %v541_v8, %s3191_s21 }
  0x6f   : > { %714 = vrot.lane.b32.xlu1 %v540_v5, %s1870_s18  ;;  %712 = vrot.lane.b32.xlu0 %v539_v6, %s1870_s18 }
  0x73   : > { %718 = vrot.lane.b32.xlu1 %v542_v7, %s1870_s18  ;;  %716 = vrot.lane.b32.xlu0 %v541_v8, %s1870_s18 }
  0x77   : > { %887 = vrot.lane.b32.xlu1 %v2060_v9, %s3191_s21  ;;  %885 = vrot.lane.b32.xlu0 %v2062_v10, %s3191_s21 }
  0x7b   : > { %891 = vrot.lane.b32.xlu1 %v2068_v12, %s3191_s21  ;;  %889 = vrot.lane.b32.xlu0 %v2070_v13, %s3191_s21 }
  0x7f   : > { %983 = vrot.lane.b32.xlu1 %v2060_v9, %s1870_s18  ;;  %981 = vrot.lane.b32.xlu0 %v2062_v10, %s1870_s18 }
  0x83   : > { %987 = vrot.lane.b32.xlu1 %v2068_v12, %s1870_s18  ;;  %985 = vrot.lane.b32.xlu0 %v2070_v13, %s1870_s18 }
  0x87   : > { %331 = vrot.lane.b32.xlu1 %v314_v14, %s1872_s20  ;;  %329 = vrot.lane.b32.xlu0 %v313_v15, %s1872_s20 }
  0x88   : > { %s1636_s15 = spop %1635 }
  0x89   : > { %s2099_s29 = spop %1637  ;;  %v381_v51 = vstv %s1636_s15 }
  0x8a   : > { %s2103_s19 = spop %1639  ;;  %v385_v2 = vstv %s2099_s29 }
  0x8b   : > { %335 = vrot.lane.b32.xlu1 %v316_v16, %s1872_s20  ;;  %333 = vrot.lane.b32.xlu0 %v315_v17, %s1872_s20  ;;  %s2105_s9 = spop %1641 }
  0x8f   : > { %339 = vrot.lane.b32.xlu1 %v318_v18, %s1872_s20  ;;  %337 = vrot.lane.b32.xlu0 %v317_v19, %s1872_s20 }
  0x93   : > { %343 = vrot.lane.b32.xlu1 %v320_v20, %s1872_s20  ;;  %341 = vrot.lane.b32.xlu0 %v319_v21, %s1872_s20 }
  0x97   : > { %1079 = vperm.xlu0 %1767, %v378_v22  }
  0xc9   : > { %v408_v23 = vpop.permute.xlu1 %407  ;;  %v404_v24 = vpop.permute.xlu0 %403 }
  0xca   : > { %1643 = vpush %v404_v24 }
  0xcd   : > { %v410_v25 = vpop.permute.xlu1 %409  ;;  %v406_v26 = vpop.permute.xlu0 %405 }
  0xce   : > { %1645 = vpush %v406_v26 }
  0xcf   : > { %1647 = vpush %v408_v23 }
  0xd0   : > { %1649 = vpush %v410_v25 }
  0xd1   : > { %v474_v27 = vpop.permute.xlu1 %473  ;;  %v472_v28 = vpop.permute.xlu0 %471 }
  0xd2   : > { %1651 = vpush %v472_v28 }
  0xd3   : > { %1653 = vpush %v474_v27 }
  0xd5   : > { %v478_v29 = vpop.permute.xlu1 %477  ;;  %v476_v30 = vpop.permute.xlu0 %475 }
  0xd6   : > { %1655 = vpush %v476_v30 }
  0xd7   : > { %1657 = vpush %v478_v29 }
  0xd8   : > { %1659 = vpush %v539_v6 }
  0xd9   : > { %1661 = vpush %v540_v5  ;;  %v619_v31 = vpop.permute.xlu1 %618  ;;  %v617_v32 = vpop.permute.xlu0 %616 }
  0xda   : > { %1663 = vpush %v541_v8 }
  0xdb   : > { %1665 = vpush %v542_v7 }
  0xdc   : > { %1667 = vpush %v617_v32 }
  0xdd   : > { %1669 = vpush %v619_v31  ;;  %v623_v33 = vpop.permute.xlu1 %622  ;;  %v621_v34 = vpop.permute.xlu0 %620 }
  0xde   : > { %1671 = vpush %v621_v34 }
  0xdf   : > { %1673 = vpush %v623_v33 }
  0xe1   : > { %v715_v35 = vpop.permute.xlu1 %714  ;;  %v713_v36 = vpop.permute.xlu0 %712 }
  0xe2   : > { %1675 = vpush %v713_v36 }
  0xe3   : > { %1677 = vpush %v715_v35 }
  0xe5   : > { %v719_v37 = vpop.permute.xlu1 %718  ;;  %v717_v38 = vpop.permute.xlu0 %716 }
  0xe6   : > { %1679 = vpush %v717_v38 }
  0xe7   : > { %1681 = vpush %v719_v37 }
  0xe8   : > { %1683 = vpush %v2062_v10 }
  0xe9   : > { %1685 = vpush %v2060_v9  ;;  %v888_v39 = vpop.permute.xlu1 %887  ;;  %v886_v40 = vpop.permute.xlu0 %885 }
  0xea   : > { %1687 = vpush %v2070_v13 }
  0xeb   : > { %1689 = vpush %v2068_v12 }
  0xec   : > { %1691 = vpush %v886_v40 }
  0xed   : > { %1693 = vpush %v888_v39  ;;  %v892_v41 = vpop.permute.xlu1 %891  ;;  %v890_v42 = vpop.permute.xlu0 %889 }
  0xee   : > { %1695 = vpush %v890_v42 }
  0xef   : > { %1697 = vpush %v892_v41 }
  0xf1   : > { %v984_v43 = vpop.permute.xlu1 %983  ;;  %v982_v44 = vpop.permute.xlu0 %981 }
  0xf2   : > { %1699 = vpush %v982_v44 }
  0xf3   : > { %1701 = vpush %v984_v43 }
  0xf5   : > { %v988_v45 = vpop.permute.xlu1 %987  ;;  %v986_v46 = vpop.permute.xlu0 %985 }
  0xf6   : > { %1703 = vpush %v986_v46 }
  0xf7   : > { %1705 = vpush %v988_v45 }
  0xf9   : > { %v332_v47 = vpop.permute.xlu1 %331  ;;  %v330_v48 = vpop.permute.xlu0 %329 }
  0xfa   : > { %355 = vst.msk [vmem:[#allocation2 + $0x9] sm:$0xff] %vm353_vm3, %v332_v47  ;;  %354 = vst.msk [vmem:[#allocation2 + $0x1] sm:$0xff] %vm353_vm3, %v330_v48 }
  0xfb   : > { %s1644_s8 = spop %1643 }
  0xfc   : > { %v412_v54 = vstv %s1644_s8 }
  0xfd   : > { %v336_v49 = vpop.permute.xlu1 %335  ;;  %v334_v50 = vpop.permute.xlu0 %333 }
  0xfe   : > { %357 = vst.msk [vmem:[#allocation2 + $0x21] sm:$0xff] %vm353_vm3, %v336_v49  ;;  %356 = vst.msk [vmem:[#allocation2 + $0x19] sm:$0xff] %vm353_vm3, %v334_v50 }
  0xff   : > { %s1646_s16 = spop %1645 }
 0x100   : > { %s2113_s11 = spop %1647  ;;  %v415_v63 = vstv %s1646_s16 }
 0x101   : > { %v2109_v52 = vld [vmem:[#allocation2] sm:$0xff]  ;;  %v2111_v53 = vld [vmem:[#allocation2 + $0x8] sm:$0xff]  ;;  %v340_v55 = vpop.permute.xlu1 %339  ;;  %v338_v56 = vpop.permute.xlu0 %337  ;;  %s2125_s20 = spop %1649  ;;  %v418_v7 = vstv %s2113_s11  ;;  %v2160_v11 = vld [vmem:[#allocation2 + $0x10] sm:$0x3] }
 0x102   : > { %v2116_v57 = vmul.f32 %v381_v51, %v2109_v52  ;;  %v2119_v58 = vmul.f32 %v381_v51, %v2111_v53  ;;  %v423_v59 = vmul.f32 %v412_v54, %v2109_v52  ;;  %v424_v60 = vmul.f32 %v412_v54, %v2111_v53  ;;  %359 = vst.msk [vmem:[#allocation2 + $0x39] sm:$0xff] %vm353_vm3, %v340_v55 }
 0x103   : > { %358 = vst.msk [vmem:[#allocation2 + $0x31] sm:$0xff] %vm353_vm3, %v338_v56  ;;  %s2127_s12 = spop %1651  ;;  %3232 = vst [vmem:[#allocation15_spill] sm:$0xff] %v2160_v11  ;;  %v421_v42 = vstv %s2125_s20 }
 0x104   : > { %3228 = vst [vmem:[#allocation11_spill] sm:$0xff] %v2116_v57  ;;  %3229 = vst [vmem:[#allocation12_spill] sm:$0xff] %v2119_v58  ;;  %441 = vrot.lane.b32.xlu1 %v424_v60, %s3191_s21  ;;  %439 = vrot.lane.b32.xlu0 %v423_v59, %s3191_s21  ;;  %s2138_s23 = spop %1653  ;;  %v480_v9 = vstv %s2127_s12 }
 0x105   : > { %v2131_v61 = vld [vmem:[#allocation2 + $0x18] sm:$0xff]  ;;  %v2133_v62 = vld [vmem:[#allocation2 + $0x20] sm:$0xff]  ;;  %v344_v0 = vpop.permute.xlu1 %343  ;;  %v342_v1 = vpop.permute.xlu0 %341  ;;  %v2172_v17 = vld [vmem:[#allocation2 + $0x28] sm:$0x3]  ;;  %v492_v25 = vmul.f32 %v480_v9, %v2111_v53  ;;  %v483_v26 = vstv %s2138_s23  ;;  %v491_v38 = vmul.f32 %v480_v9, %v2109_v52 }
 0x106   : > { %v425_v3 = vmul.f32 %v415_v63, %v2131_v61  ;;  %v426_v4 = vmul.f32 %v415_v63, %v2133_v62  ;;  %361 = vst.msk [vmem:[#allocation2 + $0x51] sm:$0xff] %vm353_vm3, %v344_v0  ;;  %360 = vst.msk [vmem:[#allocation2 + $0x49] sm:$0xff] %vm353_vm3, %v342_v1  ;;  %v2145_v5 = vmul.f32 %v385_v2, %v2133_v62  ;;  %vm1290_vm3 = vcmask 1044352  }
 0x107   : > { %s2142_s15 = spop %1655  ;;  %v2148_v6 = vmul.f32 %v385_v2, %v2131_v61  ;;  %3233 = vst [vmem:[#allocation16_spill] sm:$0xff] %v2172_v17  ;;  %v494_v36 = vmul.f32 %v483_v26, %v2133_v62  ;;  %v493_v39 = vmul.f32 %v483_v26, %v2131_v61 }
 0x108   : > { %3230 = vst [vmem:[#allocation13_spill] sm:$0xff] %v2145_v5  ;;  %s2150_s8 = spop %1657  ;;  %445 = vrot.lane.b32.xlu1 %v426_v4, %s3191_s21  ;;  %443 = vrot.lane.b32.xlu0 %v425_v3, %s3191_s21  ;;  %v486_v40 = vstv %s2142_s15 }
 0x109   : > { %3231 = vst [vmem:[#allocation14_spill] sm:$0xff] %v2148_v6  ;;  %s1660_s29 = spop %1659  ;;  %v2183_v22 = vld [vmem:[#allocation2 + $0x40] sm:$0x3]  ;;  %v489_v44 = vstv %s2150_s8 }
 0x10a   : > { %v2155_v8 = vld [vmem:[#allocation2 + $0x38] sm:$0xff]  ;;  %v2158_v10 = vld [vmem:[#allocation2 + $0x30] sm:$0xff]  ;;  %v544_v12 = vstv %s1660_s29  ;;  %s1662_s16 = spop %1661  ;;  %3234 = vst [vmem:[#allocation17_spill] sm:$0xff] %v2183_v22 }
 0x10b   : > { %v428_v13 = vmul.f32 %v418_v7, %v2155_v8  ;;  %v2164_v14 = vmul.f32 %v544_v12, %v2109_v52  ;;  %v2167_v15 = vmul.f32 %v544_v12, %v2111_v53  ;;  %v2170_v16 = vmul.f32 %v544_v12, %v2160_v11  ;;  %s1664_s11 = spop %1663 }
 0x10c   : > { %v547_v18 = vstv %s1662_s16  ;;  %v550_v23 = vstv %s1664_s11  ;;  %s1666_s12 = spop %1665  ;;  %v427_v32 = vmul.f32 %v418_v7, %v2158_v10  ;;  %v2241_v43 = vmul.f32 %v486_v40, %v2158_v10 }
 0x10d   : > { %v2175_v19 = vmul.f32 %v547_v18, %v2131_v61  ;;  %v2178_v20 = vmul.f32 %v547_v18, %v2133_v62  ;;  %v2181_v21 = vmul.f32 %v547_v18, %v2172_v17  ;;  %449 = vrot.lane.b32.xlu1 %v428_v13, %s3191_s21  ;;  %v2187_v24 = vmul.f32 %v550_v23, %v2158_v10  ;;  %s2190_s29 = spop %1667  ;;  %v2199_v29 = vld [vmem:[#allocation2 + $0x48] sm:$0xff]  ;;  %v2201_v30 = vld [vmem:[#allocation2 + $0x50] sm:$0xff]  ;;  %v2207_v33 = vld [vmem:[#allocation2 + $0x58] sm:$0x3] }
 0x10e   : > { %v2194_v27 = vmul.f32 %v550_v23, %v2155_v8  ;;  %v2197_v28 = vmul.f32 %v550_v23, %v2183_v22  ;;  %3235 = vst [vmem:[#allocation18_spill] sm:$0xff] %v2199_v29  ;;  %v553_v31 = vstv %s1666_s12  ;;  %s2203_s16 = spop %1669  ;;  %3236 = vst [vmem:[#allocation19_spill] sm:$0xff] %v2207_v33  ;;  %447 = vrot.lane.b32.xlu0 %v427_v32, %s3191_s21  ;;  %v625_v48 = vstv %s2190_s29 }
 0x10f   : > { %v2210_v34 = vmul.f32 %v553_v31, %v2199_v29  ;;  %v2213_v35 = vmul.f32 %v553_v31, %v2201_v30  ;;  %s2215_s23 = spop %1671  ;;  %v2219_v37 = vmul.f32 %v553_v31, %v2207_v33  ;;  %v2245_v45 = vmul.f32 %v486_v40, %v2155_v8 }
 0x110   : > { %s2222_s11 = spop %1673  ;;  %v2251_v49 = vmul.f32 %v489_v44, %v2199_v29  ;;  %v2254_v50 = vmul.f32 %v489_v44, %v2201_v30  ;;  %v2264_v1 = vmul.f32 %v625_v48, %v2109_v52  ;;  %v628_v2 = vstv %s2203_s16  ;;  %s3237_s16 = smov 127  }
 0x111   : > { %509 = vrot.lane.b32.xlu1 %v492_v25, %s1870_s18  ;;  %v2278_v13 = vmul.f32 %v625_v48, %v2111_v53  ;;  %v2281_v18 = vmul.f32 %v625_v48, %v2160_v11  ;;  %v2288_v26 = vmul.f32 %v628_v2, %v2131_v61  ;;  %v2291_v31 = vmul.f32 %v628_v2, %v2133_v62 }
 0x112   : > { %507 = vrot.lane.b32.xlu0 %v491_v38, %s1870_s18  ;;  %v631_v25 = vstv %s2215_s23  ;;  %v2324_v0 = vmul.f32 %v628_v2, %v2172_v17  ;;  %v430_v54 = vmul.f32 %v421_v42, %v2201_v30  ;;  %v429_v47 = vmul.f32 %v421_v42, %v2199_v29 }
 0x113   : > { %s2225_s12 = spop %1675  ;;  %v663_v55 = vrot.slane %v2281_v18, 1  ;;  %v2338_v51 = vmul.f32 %v631_v25, %v2155_v8  ;;  %v2341_v2 = vmul.f32 %v631_v25, %v2183_v22  ;;  %v634_v41 = vstv %s2222_s11 }
 0x114   : > { %s2229_s0 = spop %1677  ;;  %v2371_v6 = vmul.f32 %v634_v41, %v2199_v29  ;;  %v3250_v57 = vrot.slane %v2278_v13, 1 }
 0x115   : > { %513 = vrot.lane.b32.xlu1 %v494_v36, %s1870_s18  ;;  %v724_v46 = vstv %s2229_s0 }
 0x116   : > { %511 = vrot.lane.b32.xlu0 %v493_v39, %s1870_s18  ;;  %v2363_v63 = vmul.f32 %v724_v46, %v2133_v62 }
 0x117   : > { %s2231_s1 = spop %1679 }
 0x118   : > { %s2235_s21 = spop %1681  ;;  %3239 = vst [vmem:[#allocation21_spill] sm:$0xff] %v2363_v63  ;;  %v2366_v42 = vstv %s2231_s1 }
 0x119   : > { %s1684_s2 = spop %1683  ;;  %453 = vrot.lane.b32.xlu1 %v430_v54, %s3237_s16  ;;  %v2360_v54 = vmul.f32 %v724_v46, %v2131_v61  ;;  %3240 = vst [vmem:[#allocation22_spill] sm:$0xff] %v2366_v42  ;;  %v2395_v5 = vmul.f32 %v2366_v42, %v2158_v10 }
 0x11a   : > { %s1686_s15 = spop %1685  ;;  %v813_v60 = vstv %s1684_s2  ;;  %451 = vrot.lane.b32.xlu0 %v429_v47, %s3237_s16  ;;  %v2377_v47 = vmul.f32 %v634_v41, %v2207_v33 }
 0x11b   : > { %s1688_s20 = spop %1687  ;;  %v2268_v3 = vmul.f32 %v813_v60, %v2109_v52  ;;  %v2271_v4 = vmul.f32 %v813_v60, %v2111_v53  ;;  %v2274_v7 = vmul.f32 %v813_v60, %v2160_v11  ;;  %v816_v9 = vstv %s1686_s15  ;;  %3238 = vst [vmem:[#allocation20_spill] sm:$0xff] %v2360_v54  ;;  %s1876_s15 = smov 64  }
 0x11c   : > { %s1690_s2 = spop %1689  ;;  %v2284_v23 = vmul.f32 %v816_v9, %v2131_v61  ;;  %v2294_v32 = vmul.f32 %v816_v9, %v2133_v62  ;;  %v2298_v38 = vmul.f32 %v816_v9, %v2172_v17  ;;  %v819_v39 = vstv %s1688_s20  ;;  %3241 = vst [vmem:[#allocation23_spill] sm:$0xff] %v2377_v47  ;;  %s1877_s20 = smov 80  }
 0x11d   : > { %v822_v40 = vstv %s1690_s2  ;;  %v2302_v48 = vmul.f32 %v819_v39, %v2158_v10  ;;  %v2305_v60 = vmul.f32 %v819_v39, %v2155_v8  ;;  %v2308_v12 = vmul.f32 %v819_v39, %v2183_v22  ;;  %s2320_s8 = spop %1691  ;;  %517 = vrot.lane.b32.xlu1 %v2245_v45, %s1870_s18  ;;  %s1878_s2 = smov 96  }
 0x11e   : > { %v2312_v36 = vmul.f32 %v822_v40, %v2199_v29  ;;  %v2315_v9 = vmul.f32 %v822_v40, %v2201_v30  ;;  %v2318_v59 = vmul.f32 %v822_v40, %v2207_v33  ;;  %v721_v39 = vstv %s2225_s12  ;;  %s2332_s29 = spop %1693  ;;  %515 = vrot.lane.b32.xlu0 %v2241_v43, %s1870_s18 }
 0x11f   : > { %v2335_v40 = vmul.f32 %v631_v25, %v2158_v10  ;;  %s2345_s23 = spop %1695  ;;  %v2349_v18 = vmul.f32 %v721_v39, %v2109_v52  ;;  %v2352_v56 = vmul.f32 %v721_v39, %v2111_v53  ;;  %v2355_v44 = vmul.f32 %v721_v39, %v2160_v11 }
 0x120   : > { %s2368_s0 = spop %1697  ;;  %v2374_v39 = vmul.f32 %v634_v41, %v2201_v30  ;;  %v2380_v25 = vmul.f32 %v724_v46, %v2172_v17  ;;  %v2386_v11 = vstv %s2320_s8  ;;  %v2403_v45 = vmul.f32 %v2366_v42, %v2155_v8  ;;  %s1879_s8 = smov 112  }
 0x121   : > { %3243 = vst [vmem:[#allocation25_spill] sm:$0xff] %v2386_v11  ;;  %v2406_v41 = vstv %s2332_s29  ;;  %v905_v17 = vmul.f32 %v2386_v11, %v2109_v52  ;;  %v2412_v33 = vstv %s2345_s23  ;;  %v2417_v43 = vstv %s2235_s21  ;;  %521 = vrot.lane.b32.xlu1 %v2254_v50, %s1870_s18 }
 0x122   : > { %3242 = vst [vmem:[#allocation24_spill] sm:$0xff] %v2380_v25  ;;  %3244 = vst [vmem:[#allocation26_spill] sm:$0xff] %v2403_v45  ;;  %v2427_v46 = vmul.f32 %v2386_v11, %v2111_v53  ;;  %v908_v47 = vmul.f32 %v2406_v41, %v2131_v61  ;;  %v2433_v54 = vmul.f32 %v2406_v41, %v2133_v62  ;;  %519 = vrot.lane.b32.xlu0 %v2251_v49, %s1870_s18 }
 0x123   : > { %s1700_s11 = spop %1699  ;;  %3245 = vst [vmem:[#allocation27_spill] sm:$0xff] %v2406_v41  ;;  %3246 = vst [vmem:[#allocation28_spill] sm:$0xff] %v2412_v33  ;;  %v664_v50 = vsel %vm579_vm4, %v3250_v57, %v663_v55  ;;  %v911_v58 = vmul.f32 %v2412_v33, %v2158_v10  ;;  %v2444_v11 = vmul.f32 %v2412_v33, %v2155_v8  ;;  %v929_v45 = vrot.slane %v905_v17, 2 }
 0x124   : > { %s1702_s1 = spop %1701  ;;  %v2414_v22 = vstv %s1700_s11  ;;  %3248 = vst [vmem:[#allocation30_spill] sm:$0xff] %v2417_v43  ;;  %v3252_v33 = vrot.slane %v2278_v13, 1 }
 0x125   : > { %3247 = vst [vmem:[#allocation29_spill] sm:$0xff] %v2414_v22  ;;  %v2423_v42 = vstv %s1702_s1  ;;  %v1001_v43 = vmul.f32 %v2414_v22, %v2109_v52  ;;  %v2452_v49 = vmul.f32 %v2414_v22, %v2111_v53  ;;  %682 = vrot.lane.b32.xlu1 %v664_v50, %s3237_s16  ;;  %v3253_v52 = vrot.slane %v2264_v1, 1 }
 0x126   : > { %3249 = vst [vmem:[#allocation31_spill] sm:$0xff] %v2423_v42  ;;  %v1004_v57 = vmul.f32 %v2423_v42, %v2131_v61  ;;  %v2458_v55 = vmul.f32 %v2423_v42, %v2133_v62  ;;  %v934_v42 = vrot.slane %v908_v47, 2  ;;  %v3255_v50 = vrot.slane %v2324_v0, 1 }
 0x127   : > { %s1704_s12 = spop %1703  ;;  %v662_v63 = vsel %vm579_vm4, %v3253_v52, %v3252_v33  ;;  %v939_v33 = vrot.slane %v911_v58, 2  ;;  %v1025_v52 = vrot.slane %v1001_v43, 2  ;;  %v852_v58 = vrot.slane %v2274_v7, 2 }
 0x128   : > { %s1706_s21 = spop %1705  ;;  %v2448_v41 = vstv %s1704_s12  ;;  %680 = vrot.lane.b32.xlu0 %v662_v63, %s3237_s16  ;;  %v1030_v25 = vrot.slane %v1004_v57, 2  ;;  %v3256_v63 = vrot.slane %v2291_v31, 1  ;;  %v3258_v22 = vrot.slane %v2288_v26, 1 }
 0x129   : > { %3251 = vst [vmem:[#allocation32_spill] sm:$0xff] %v2448_v41  ;;  %v1007_v17 = vmul.f32 %v2448_v41, %v2158_v10  ;;  %v2470_v53 = vmul.f32 %v2448_v41, %v2155_v8  ;;  %v2472_v61 = vstv %s1706_s21  ;;  %v854_v47 = vrot.slane %v2284_v23, 2 }
 0x12a   : > { %3254 = vst [vmem:[#allocation33_spill] sm:$0xff] %v2472_v61  ;;  %v1010_v1 = vmul.f32 %v2472_v61, %v2199_v29  ;;  %v2482_v41 = vmul.f32 %v2472_v61, %v2201_v30  ;;  %v669_v62 = vsel %vm579_vm4, %v3256_v63, %v3255_v50  ;;  %v3257_v13 = vmov %v3256_v63 }
 0x12b   : > { %v1035_v29 = vrot.slane %v1007_v17, 2  ;;  %v1036_v43 = vrot.slane %v2470_v53, 2  ;;  %686 = vrot.lane.b32.xlu1 %v669_v62, %s3237_s16  ;;  %v667_v57 = vsel %vm579_vm4, %v3258_v22, %v3257_v13  ;;  %v3259_v7 = vrot.slane %v2427_v46, 2 }
 0x12c   : > { %v1040_v0 = vrot.slane %v1010_v1, 2  ;;  %v1041_v61 = vrot.slane %v2482_v41, 2  ;;  %684 = vrot.lane.b32.xlu0 %v667_v57, %s3237_s16  ;;  %v855_v62 = vrot.slane %v2294_v32, 2  ;;  %v857_v31 = vrot.slane %v2298_v38, 2 }
 0x12d   : > { %v2505_v17 = vsel %vm848_vm5, %v929_v45, %v3259_v7  ;;  %v3260_v26 = vrot.slane %v2433_v54, 2  ;;  %v3261_v23 = vrot.slane %v2444_v11, 2  ;;  %v859_v1 = vrot.slane %v2302_v48, 2 }
 0x12e   : > { %v3262_v13 = vrot.slane %v2341_v2, 1  ;;  %v3263_v45 = vrot.slane %v2338_v51, 1  ;;  %v3264_v38 = vrot.slane %v2452_v49, 2  ;;  %v3265_v63 = vrot.slane %v2458_v55, 2 }
 0x12f   : > { %v2512_v22 = vsel %vm848_vm5, %v934_v42, %v3260_v26  ;;  %v2517_v50 = vsel %vm848_vm5, %v939_v33, %v3261_v23  ;;  %v860_v48 = vrot.slane %v2305_v60, 2  ;;  %v862_v2 = vrot.slane %v2308_v12, 2 }
 0x130   : > { %v674_v32 = vsel %vm579_vm4, %v3263_v45, %v3262_v13  ;;  %v2528_v42 = vsel %vm848_vm5, %v1025_v52, %v3264_v38  ;;  %v2533_v33 = vsel %vm848_vm5, %v1030_v25, %v3265_v63  ;;  %v3266_v57 = vmov %v3263_v45 }
 0x131   : > { %690 = vrot.lane.b32.xlu1 %v674_v32, %s3237_s16  ;;  %v3267_v7 = vrot.slane %v2335_v40, 1  ;;  %v2546_v52 = vsel %vm848_vm5, %v1035_v29, %v1036_v43  ;;  %v864_v25 = vrot.slane %v2312_v36, 2  ;;  %v865_v23 = vrot.slane %v2315_v9, 2 }
 0x132   : > { %v867_v60 = vrot.slane %v2318_v59, 2  ;;  %v2555_v51 = vsel %vm848_vm5, %v1040_v0, %v1041_v61  ;;  %v3268_v12 = vrot.slane %v2355_v44, 1  ;;  %v3269_v40 = vrot.slane %v2352_v56, 1 }
 0x133   : > { %v672_v26 = vsel %vm579_vm4, %v3267_v7, %v3266_v57  ;;  %v3271_v36 = vrot.slane %v2349_v18, 1  ;;  %v3272_v59 = vstv %s2103_s19  ;;  %v3274_v44 = vrot.slane %v2170_v16, 1  ;;  %s1874_s19 = smov 32  }
 0x134   : > { %688 = vrot.lane.b32.xlu0 %v672_v26, %s3237_s16  ;;  %v760_v29 = vsel %vm579_vm4, %v3269_v40, %v3268_v12  ;;  %v3270_v13 = vmov %v3269_v40  ;;  %v2570_v45 = vmul.f32 %v3272_v59, %v2155_v8  ;;  %v3273_v32 = vmov %v3272_v59 }
 0x135   : > { %v758_v9 = vsel %vm579_vm4, %v3271_v36, %v3270_v13  ;;  %v2575_v0 = vmul.f32 %v3273_v32, %v2158_v10  ;;  %v3275_v38 = vrot.slane %v2167_v15, 1  ;;  %v3277_v18 = vrot.slane %v2164_v14, 1  ;;  %778 = vrot.lane.b32.xlu1 %v760_v29, %s1870_s18 }
 0x136   : > { %v3278_v8 = vrot.slane %v2181_v21, 1  ;;  %v3279_v7 = vrot.slane %v2178_v20, 1  ;;  %v3281_v26 = vrot.slane %v2175_v19, 1  ;;  %v3282_v14 = vrot.slane %v2197_v28, 1 }
 0x137   : > { %v2582_v63 = vsel %vm579_vm4, %v3275_v38, %v3274_v44  ;;  %v3276_v56 = vmov %v3275_v38  ;;  %v3283_v15 = vrot.slane %v2194_v27, 1  ;;  %v3285_v13 = vrot.slane %v2187_v24, 1 }
 0x138   : > { %v2589_v57 = vsel %vm579_vm4, %v3277_v18, %v3276_v56  ;;  %v2596_v10 = vsel %vm579_vm4, %v3279_v7, %v3278_v8  ;;  %v3280_v16 = vmov %v3279_v7  ;;  %v3286_v19 = vrot.slane %v2213_v35, 1  ;;  %776 = vrot.lane.b32.xlu0 %v758_v9, %s1870_s18  ;;  %v3295_v7 = vld [vmem:[#allocation21_spill] sm:$0xff] }
 0x139   : > { %v2603_v12 = vsel %vm579_vm4, %v3281_v26, %v3280_v16  ;;  %v2611_v21 = vsel %vm579_vm4, %v3283_v15, %v3282_v14  ;;  %v3284_v40 = vmov %v3283_v15  ;;  %v3287_v36 = vrot.slane %v2210_v34, 1  ;;  %v3298_v16 = vld [vmem:[#allocation18_spill] sm:$0xff]  ;;  %v3303_v14 = vld [vmem:[#allocation23_spill] sm:$0xff] }
 0x13a   : > { %v2618_v20 = vsel %vm579_vm4, %v3285_v13, %v3284_v40  ;;  %v3288_v28 = vrot.slane %v2219_v37, 1  ;;  %v3289_v59 = vmov %v3286_v19  ;;  %v3290_v24 = vrot.slane %v2271_v4, 2  ;;  %v3304_v40 = vld [vmem:[#allocation17_spill] sm:$0xff]  ;;  %v3305_v13 = vld [vmem:[#allocation22_spill] sm:$0xff] }
 0x13b   : > { %v2625_v29 = vsel %vm579_vm4, %v3287_v36, %v3286_v19  ;;  %v3291_v27 = vrot.slane %v2268_v3, 2  ;;  %v2643_v34 = vsel %vm848_vm5, %v854_v47, %v855_v62  ;;  %v2651_v35 = vsel %vm848_vm5, %v859_v1, %v860_v48  ;;  %v3293_v1 = vld [vmem:[#allocation24_spill] sm:$0xff] }
 0x13c   : > { %v2632_v32 = vsel %vm579_vm4, %v3289_v59, %v3288_v28  ;;  %v3292_v38 = vmov %v3290_v24  ;;  %v2654_v9 = vsel %vm848_vm5, %v855_v62, %v857_v31  ;;  %v2657_v56 = vsel %vm848_vm5, %v860_v48, %v862_v2  ;;  %v3297_v48 = vld [vmem:[#allocation26_spill] sm:$0xff] }
 0x13d   : > { %v2640_v44 = vsel %vm848_vm5, %v3291_v27, %v3290_v24  ;;  %v2648_v37 = vsel %vm848_vm5, %v3292_v38, %v852_v58  ;;  %v2660_v3 = vsel %vm848_vm5, %v864_v25, %v865_v23  ;;  %v2663_v47 = vsel %vm848_vm5, %v865_v23, %v867_v60  ;;  %v3299_v25 = vld [vmem:[#allocation30_spill] sm:$0xff]  ;;  %v3306_v38 = vld [vmem:[#allocation19_spill] sm:$0xff] }
 0x13e   : > { %v675_v4 = vrot.slane %v2371_v6, 1  ;;  %v676_v58 = vrot.slane %v2374_v39, 1  ;;  %v766_v18 = vrot.slane %v2395_v5, 1  ;;  %v3294_v8 = vrot.slane %v3293_v1, 1  ;;  %v3301_v39 = vld [vmem:[#allocation20_spill] sm:$0xff] }
 0x13f   : > { %v3296_v62 = vrot.slane %v3295_v7, 1  ;;  %v767_v2 = vrot.slane %v3297_v48, 1  ;;  %v741_v26 = vmul.f32 %v3299_v25, %v3298_v16  ;;  %v742_v23 = vmul.f32 %v3299_v25, %v2201_v30 }
 0x140   : > { %v3302_v5 = vrot.slane %v3301_v39, 1  ;;  %v678_v15 = vrot.slane %v3303_v14, 1  ;;  %v740_v19 = vmul.f32 %v3305_v13, %v3304_v40  ;;  %v677_v36 = vsel %vm579_vm4, %v675_v4, %v676_v58  ;;  %v3313_v13 = vld [vmem:[#allocation29_spill] sm:$0xff] }
 0x141   : > { %v765_v31 = vsel %vm579_vm4, %v3296_v62, %v3294_v8  ;;  %v3300_v6 = vmov %v3296_v62  ;;  %v771_v28 = vrot.slane %v741_v26, 1  ;;  %v772_v59 = vrot.slane %v742_v23, 1  ;;  %v3307_v62 = vld [vmem:[#allocation15_spill] sm:$0xff] }
 0x142   : > { %782 = vrot.lane.b32.xlu1 %v765_v31, %s1870_s18  ;;  %v763_v60 = vsel %vm579_vm4, %v3302_v5, %v3300_v6  ;;  %v768_v24 = vsel %vm579_vm4, %v766_v18, %v767_v2  ;;  %v769_v27 = vrot.slane %v740_v19, 1  ;;  %v743_v1 = vmul.f32 %v3299_v25, %v3306_v38  ;;  %v3308_v31 = vld [vmem:[#allocation25_spill] sm:$0xff]  ;;  %v3310_v26 = vld [vmem:[#allocation27_spill] sm:$0xff]  ;;  %v3311_v5 = vld [vmem:[#allocation28_spill] sm:$0xff] }
 0x143   : > { %780 = vrot.lane.b32.xlu0 %v763_v60, %s1870_s18  ;;  %v679_v8 = vsel %vm579_vm4, %v676_v58, %v678_v15  ;;  %v773_v7 = vsel %vm579_vm4, %v771_v28, %v772_v59  ;;  %v907_v48 = vmul.f32 %v3308_v31, %v3307_v62  ;;  %v3309_v58 = vld [vmem:[#allocation16_spill] sm:$0xff]  ;;  %v3312_v60 = vrot.slane %v2427_v46, 2 }
 0x144   : > { %v774_v4 = vrot.slane %v743_v1, 1  ;;  %v770_v18 = vsel %vm579_vm4, %v767_v2, %v769_v27  ;;  %v910_v23 = vmul.f32 %v3310_v26, %v3309_v58  ;;  %v913_v2 = vmul.f32 %v3311_v5, %v3304_v40  ;;  %v3321_v5 = vld [vmem:[#allocation12_spill] sm:$0xff] }
 0x145   : > { %v932_v25 = vrot.slane %v907_v48, 2  ;;  %v1003_v19 = vmul.f32 %v3313_v13, %v3307_v62  ;;  %v3316_v27 = vrot.slane %v2444_v11, 2  ;;  %v3318_v48 = vld [vmem:[#allocation32_spill] sm:$0xff] }
 0x146   : > { %692 = vrot.lane.b32.xlu1 %v677_v36, %s3237_s16  ;;  %v775_v6 = vsel %vm579_vm4, %v772_v59, %v774_v4  ;;  %v937_v39 = vrot.slane %v910_v23, 2  ;;  %v942_v15 = vrot.slane %v913_v2, 2  ;;  %vm1479_vm4 = vcmask 1043456  }
 0x147   : > { %784 = vrot.lane.b32.xlu0 %v768_v24, %s1870_s18  ;;  %v933_v14 = vsel %vm848_vm5, %v3312_v60, %v932_v25  ;;  %v1028_v59 = vrot.slane %v1003_v19, 2  ;;  %v3319_v25 = vrot.slane %v2458_v55, 2 }
 0x148   : > { %v943_v1 = vsel %vm848_vm5, %v3316_v27, %v942_v15  ;;  %v3324_v15 = vld [vmem:[#allocation14_spill] sm:$0xff] }
 0x14a   : > { %694 = vrot.lane.b32.xlu1 %v679_v8, %s3237_s16 }
 0x14b   : > { %788 = vrot.lane.b32.xlu0 %v773_v7, %s1870_s18 }
 0x14e   : > { %786 = vrot.lane.b32.xlu1 %v770_v18, %s1870_s18  ;;  %v1009_v18 = vmul.f32 %v3318_v48, %v3304_v40 }
 0x14f   : > { %949 = vrot.lane.b32.xlu0 %v2505_v17, %s3237_s16  ;;  %v903_v17 = vstv %s2368_s0 }
 0x150   : > { %v914_v28 = vmul.f32 %v903_v17, %v3298_v16  ;;  %v915_v46 = vmul.f32 %v903_v17, %v2201_v30  ;;  %v916_v7 = vmul.f32 %v903_v17, %v3306_v38  ;;  %v3323_v17 = vld [vmem:[#allocation13_spill] sm:$0xff] }
 0x152   : > { %790 = vrot.lane.b32.xlu1 %v775_v6, %s1870_s18  ;;  %v945_v8 = vrot.slane %v915_v46, 2  ;;  %v947_v31 = vrot.slane %v916_v7, 2  ;;  %v2762_v6 = vpop.permute.xlu0 %1079 }
 0x153   : > { %953 = vrot.lane.b32.xlu0 %v2512_v22, %s3237_s16  ;;  %v3314_v22 = vrot.slane %v2433_v54, 2  ;;  %v944_v54 = vrot.slane %v914_v28, 2 }
 0x154   : > { %v948_v23 = vsel %vm848_vm5, %v945_v8, %v947_v31 }
 0x155   : > { %v938_v36 = vsel %vm848_vm5, %v3314_v22, %v937_v39  ;;  %v946_v11 = vsel %vm848_vm5, %v944_v54, %v945_v8 }
 0x156   : > { %951 = vrot.lane.b32.xlu1 %v933_v14, %s3237_s16 }
 0x157   : > { %957 = vrot.lane.b32.xlu0 %v2517_v50, %s3237_s16  ;;  %v3315_v50 = vld [vmem:[#allocation31_spill] sm:$0xff] }
 0x158   : > { %v1006_v24 = vmul.f32 %v3315_v50, %v3309_v58  ;;  %v3320_v58 = vld [vmem:[#allocation33_spill] sm:$0xff] }
 0x159   : > { %v1012_v26 = vmul.f32 %v3320_v58, %v3306_v38 }
 0x15a   : > { %955 = vrot.lane.b32.xlu1 %v938_v36, %s3237_s16  ;;  %v1033_v4 = vrot.slane %v1006_v24, 2 }
 0x15b   : > { %1045 = vrot.lane.b32.xlu0 %v2528_v42, %s1870_s18  ;;  %v3317_v42 = vrot.slane %v2452_v49, 2  ;;  %v1038_v49 = vrot.slane %v1009_v18, 2  ;;  %v1043_v40 = vrot.slane %v1012_v26, 2 }
 0x15d   : > { %v1029_v62 = vsel %vm848_vm5, %v3317_v42, %v1028_v59  ;;  %v1039_v55 = vsel %vm848_vm5, %v1036_v43, %v1038_v49 }
 0x15e   : > { %959 = vrot.lane.b32.xlu1 %v943_v1, %s3237_s16 }
 0x15f   : > { %1049 = vrot.lane.b32.xlu0 %v2533_v33, %s1870_s18  ;;  %v1034_v33 = vsel %vm848_vm5, %v3319_v25, %v1033_v4 }
 0x162   : > { %1047 = vrot.lane.b32.xlu1 %v1029_v62, %s1870_s18  ;;  %v393_v62 = vstv %s2105_s9  ;;  %s1875_s9 = smov 48  }
 0x163   : > { %961 = vrot.lane.b32.xlu0 %v946_v11, %s3237_s16  ;;  %v401_v48 = vmul.f32 %v393_v62, %v3298_v16 }
 0x166   : > { %1051 = vrot.lane.b32.xlu1 %v1034_v33, %s1870_s18 }
 0x167   : > { %1053 = vrot.lane.b32.xlu0 %v2546_v52, %s1870_s18  ;;  %v1044_v52 = vsel %vm848_vm5, %v1041_v61, %v1043_v40  ;;  %vm1486_vm5 = vcmask 3072  }
 0x16a   : > { %963 = vrot.lane.b32.xlu1 %v948_v23, %s3237_s16 }
 0x16b   : > { %1057 = vrot.lane.b32.xlu0 %v2555_v51, %s1870_s18  ;;  %v3322_v51 = vld [vmem:[#allocation11_spill] sm:$0xff] }
 0x16e   : > { %1055 = vrot.lane.b32.xlu1 %v1039_v55, %s1870_s18 }
 0x172   : > { %1059 = vrot.lane.b32.xlu1 %v1044_v52, %s1870_s18  ;;  %s1873_s18 = smov 16  }
 0x176   : > { %v442_v38 = vpop.permute.xlu1 %441  ;;  %v440_v39 = vpop.permute.xlu0 %439 }
 0x177   : > { %v464_v2 = vadd.f32 %v442_v38, %v3321_v5  ;;  %v463_v60 = vadd.f32 %v440_v39, %v3322_v51 }
 0x17a   : > { %v446_v14 = vpop.permute.xlu1 %445  ;;  %v444_v53 = vpop.permute.xlu0 %443 }
 0x17b   : > { %v466_v43 = vadd.f32 %v446_v14, %v3323_v17  ;;  %v465_v13 = vadd.f32 %v444_v53, %v3324_v15 }
 0x17f   : > { %v450_v19 = vpop.permute.xlu1 %449 }
 0x180   : > { %v468_v22 = vadd.f32 %v450_v19, %v2570_v45  ;;  %v448_v36 = vpop.permute.xlu0 %447 }
 0x181   : > { %v467_v28 = vadd.f32 %v448_v36, %v2575_v0  ;;  %v402_v0 = vmul.f32 %v393_v62, %v2201_v30 }
 0x183   : > { %v510_v41 = vpop.permute.xlu1 %509 }
 0x184   : > { %v532_v61 = vadd.f32 %v510_v41, %v464_v2  ;;  %v508_v24 = vpop.permute.xlu0 %507 }
 0x185   : > { %v531_v27 = vadd.f32 %v508_v24, %v463_v60 }
 0x186   : > { %v609_v46 = vadd.f32 %v2582_v63, %v532_v61 }
 0x187   : > { %v514_v59 = vpop.permute.xlu1 %513  ;;  %v608_v54 = vadd.f32 %v2589_v57, %v531_v27 }
 0x188   : > { %v534_v50 = vadd.f32 %v514_v59, %v466_v43  ;;  %v512_v8 = vpop.permute.xlu0 %511 }
 0x189   : > { %v533_v7 = vadd.f32 %v512_v8, %v465_v13 }
 0x18a   : > { %v611_v1 = vadd.f32 %v2596_v10, %v534_v50 }
 0x18b   : > { %v610_v45 = vadd.f32 %v2603_v12, %v533_v7  ;;  %v454_v4 = vpop.permute.xlu1 %453 }
 0x18c   : > { %v452_v42 = vpop.permute.xlu0 %451  ;;  %v470_v25 = vadd.f32 %v454_v4, %v402_v0 }
 0x18d   : > { %v469_v33 = vadd.f32 %v452_v42, %v401_v48  ;;  %v2802_v48 = vrot.slane %v2762_v6, 7 }
 0x18f   : > { %v518_v11 = vpop.permute.xlu1 %517 }
 0x190   : > { %v536_v31 = vadd.f32 %v518_v11, %v468_v22  ;;  %v516_v63 = vpop.permute.xlu0 %515 }
 0x191   : > { %v535_v18 = vadd.f32 %v516_v63, %v467_v28 }
 0x192   : > { %v613_v10 = vadd.f32 %v2611_v21, %v536_v31  ;;  %v2796_v31 = vrot.slane %v2762_v6, 1 }
 0x193   : > { %v522_v57 = vpop.permute.xlu1 %521  ;;  %v612_v49 = vadd.f32 %v2618_v20, %v535_v18  ;;  %v2811_v18 = vrot.slane %v2762_v6, 4 }
 0x194   : > { %v538_v58 = vadd.f32 %v522_v57, %v470_v25  ;;  %v520_v12 = vpop.permute.xlu0 %519 }
 0x195   : > { %v537_v26 = vadd.f32 %v520_v12, %v469_v33 }
 0x196   : > { %v615_v23 = vadd.f32 %v2632_v32, %v538_v58 }
 0x197   : > { %v683_v40 = vpop.permute.xlu1 %682  ;;  %v614_v30 = vadd.f32 %v2625_v29, %v537_v26 }
 0x198   : > { %v705_v5 = vadd.f32 %v683_v40, %v609_v46 }
 0x19a   : > { %v681_v55 = vpop.permute.xlu0 %680 }
 0x19b   : > { %v704_v2 = vadd.f32 %v681_v55, %v608_v54 }
 0x19d   : > { %v687_v52 = vpop.permute.xlu1 %686 }
 0x19e   : > { %v685_v38 = vpop.permute.xlu0 %684  ;;  %v707_v20 = vadd.f32 %v687_v52, %v611_v1 }
 0x19f   : > { %v706_v17 = vadd.f32 %v685_v38, %v610_v45 }
 0x1a3   : > { %v691_v16 = vpop.permute.xlu1 %690 }
 0x1a4   : > { %v709_v27 = vadd.f32 %v691_v16, %v613_v10  ;;  %v2816_v10 = vrot.slane %v2762_v6, 3 }
 0x1a6   : > { %v689_v39 = vpop.permute.xlu0 %688 }
 0x1a7   : > { %v779_v21 = vpop.permute.xlu1 %778  ;;  %v708_v22 = vadd.f32 %v689_v39, %v612_v49 }
 0x1a8   : > { %v801_v51 = vadd.f32 %v779_v21, %v705_v5 }
 0x1aa   : > { %v777_v60 = vpop.permute.xlu0 %776  ;;  %v878_v53 = vadd.f32 %v2648_v37, %v801_v51 }
 0x1ab   : > { %v800_v14 = vadd.f32 %v777_v60, %v704_v2 }
 0x1ad   : > { %v877_v32 = vadd.f32 %v2640_v44, %v800_v14 }
 0x1b4   : > { %v783_v43 = vpop.permute.xlu1 %782 }
 0x1b5   : > { %v803_v15 = vadd.f32 %v783_v43, %v707_v20  ;;  %v781_v29 = vpop.permute.xlu0 %780 }
 0x1b6   : > { %v802_v13 = vadd.f32 %v781_v29, %v706_v17 }
 0x1b7   : > { %v880_v19 = vadd.f32 %v2654_v9, %v803_v15 }
 0x1b8   : > { %v693_v41 = vpop.permute.xlu1 %692  ;;  %v879_v61 = vadd.f32 %v2643_v34, %v802_v13 }
 0x1b9   : > { %v785_v36 = vpop.permute.xlu0 %784  ;;  %v710_v46 = vadd.f32 %v693_v41, %v614_v30 }
 0x1ba   : > { %v804_v28 = vadd.f32 %v785_v36, %v708_v22 }
 0x1bc   : > { %v695_v59 = vpop.permute.xlu1 %694  ;;  %v881_v50 = vadd.f32 %v2651_v35, %v804_v28 }
 0x1bd   : > { %v789_v37 = vpop.permute.xlu0 %788  ;;  %v711_v7 = vadd.f32 %v695_v59, %v615_v23 }
 0x1be   : > { %v806_v24 = vadd.f32 %v789_v37, %v710_v46 }
 0x1c0   : > { %v787_v1 = vpop.permute.xlu1 %786  ;;  %v883_v44 = vadd.f32 %v2660_v3, %v806_v24  ;;  %v2799_v3 = vrot.slane %v2762_v6, 2 }
 0x1c1   : > { %v805_v54 = vadd.f32 %v787_v1, %v709_v27  ;;  %v950_v8 = vpop.permute.xlu0 %949 }
 0x1c2   : > { %v973_v35 = vadd.f32 %v950_v8, %v877_v32 }
 0x1c3   : > { %v882_v9 = vadd.f32 %v2657_v56, %v805_v54  ;;  %v2805_v56 = vrot.slane %v2762_v6, 6 }
 0x1c4   : > { %v791_v45 = vpop.permute.xlu1 %790 }
 0x1c5   : > { %v807_v4 = vadd.f32 %v791_v45, %v711_v7  ;;  %v954_v34 = vpop.permute.xlu0 %953 }
 0x1c6   : > { %v975_v33 = vadd.f32 %v954_v34, %v879_v61 }
 0x1c7   : > { %v2793_v42 = vadd.f32 %v2663_v47, %v807_v4  ;;  %v2808_v47 = vrot.slane %v2762_v6, 5 }
 0x1c8   : > { %v952_v62 = vpop.permute.xlu1 %951 }
 0x1c9   : > { %v958_v11 = vpop.permute.xlu0 %957  ;;  %v974_v57 = vadd.f32 %v952_v62, %v878_v53 }
 0x1ca   : > { %v977_v49 = vadd.f32 %v958_v11, %v881_v50 }
 0x1cc   : > { %v956_v0 = vpop.permute.xlu1 %955 }
 0x1cd   : > { %v1046_v63 = vpop.permute.xlu0 %1045  ;;  %v976_v58 = vadd.f32 %v956_v0, %v880_v19 }
 0x1ce   : > { %v2813_v25 = vadd.f32 %v1046_v63, %v973_v35 }
 0x1d0   : > { %v960_v12 = vpop.permute.xlu1 %959  ;;  %v1116_v26 = vadd.f32 %v2802_v48, %v2813_v25  ;;  %v1140_v23 = vadd.f32 %v2805_v56, %v2813_v25  ;;  %v1164_v40 = vadd.f32 %v2808_v47, %v2813_v25  ;;  %v2826_v30 = vadd.f32 %v2811_v18, %v2813_v25 }
 0x1d1   : > { %v2828_v55 = vadd.f32 %v960_v12, %v882_v9  ;;  %v1050_v52 = vpop.permute.xlu0 %1049  ;;  %v1214_v38 = vadd.f32 %v2816_v10, %v2813_v25  ;;  %v2834_v16 = vadd.f32 %v2799_v3, %v2813_v25  ;;  %v2838_v39 = vadd.f32 %v2796_v31, %v2813_v25 }
 0x1d2   : > { %v2840_v5 = vadd.f32 %v1050_v52, %v975_v33  ;;  %v1124_v2 = vrot.slane %v1116_v26, 1  ;;  %v1148_v21 = vrot.slane %v1140_v23, 2  ;;  %v1172_v51 = vrot.slane %v1164_v40, 3 }
 0x1d3   : > { %v1196_v60 = vcombine.high %v2826_v30, %v2826_v30  ;;  %v1222_v14 = vcombine.high %v1214_v38, %v1214_v38  ;;  %v1248_v20 = vcombine.high %v2834_v16, %v2834_v16  ;;  %v1274_v53 = vcombine.high %v2838_v39, %v2838_v39 }
 0x1d4   : > { %v1048_v17 = vpop.permute.xlu1 %1047  ;;  %v1117_v43 = vadd.f32 %v2762_v6, %v2840_v5  ;;  %v1141_v32 = vadd.f32 %v2802_v48, %v2840_v5  ;;  %v1165_v15 = vadd.f32 %v2805_v56, %v2840_v5  ;;  %v1189_v29 = vadd.f32 %v2808_v47, %v2840_v5 }
 0x1d5   : > { %v2856_v13 = vadd.f32 %v1048_v17, %v974_v57  ;;  %v962_v19 = vpop.permute.xlu0 %961  ;;  %v1215_v22 = vadd.f32 %v2811_v18, %v2840_v5  ;;  %v1226_v41 = vrot.slane %v1222_v14, 1  ;;  %v2862_v61 = vadd.f32 %v2816_v10, %v2840_v5 }
 0x1d6   : > { %v979_v36 = vadd.f32 %v962_v19, %v883_v44  ;;  %v1125_v28 = vsel %vm1097_vm6, %v1117_v43, %v1124_v2  ;;  %v1149_v46 = vrot.slane %v1141_v32, 1  ;;  %v1173_v59 = vrot.slane %v1165_v15, 2 }
 0x1d7   : > { %v1126_v50 = vsel %vm1099_vm7, %v1117_v43, %v1125_v28  ;;  %v1311_v37 = vadd.f32 %v2802_v48, %v2856_v13  ;;  %v1332_v24 = vadd.f32 %v2805_v56, %v2856_v13  ;;  %v1197_v27 = vcombine.high %v1189_v29, %v1189_v29 }
 0x1d8   : > { %v1052_v1 = vpop.permute.xlu1 %1051  ;;  %v1150_v54 = vsel %vm1097_vm6, %v1149_v46, %v1148_v21  ;;  %v1174_v8 = vsel %vm1097_vm6, %v1173_v59, %v1172_v51  ;;  %v2874_v44 = vadd.f32 %v2808_v47, %v2856_v13  ;;  %v2876_v7 = vcombine.high %v1215_v22, %v1215_v22 }
 0x1d9   : > { %v2878_v9 = vadd.f32 %v1052_v1, %v976_v58  ;;  %v1054_v45 = vpop.permute.xlu0 %1053  ;;  %v1151_v4 = vsel %vm1099_vm7, %v1149_v46, %v1150_v54  ;;  %v1319_v34 = vrot.slane %v1311_v37, 1  ;;  %v1175_v62 = vsel %vm1099_vm7, %v1173_v59, %v1174_v8 }
 0x1da   : > { %v2882_v11 = vadd.f32 %v1054_v45, %v977_v49  ;;  %v1340_v35 = vrot.slane %v1332_v24, 2  ;;  %v1200_v0 = vrot.slane %v1197_v27, 7  ;;  %v1361_v63 = vrot.slane %v2874_v44, 3 }
 0x1db   : > { %v1312_v33 = vadd.f32 %v2762_v6, %v2878_v9  ;;  %v1333_v57 = vadd.f32 %v2802_v48, %v2878_v9  ;;  %v2891_v58 = vadd.f32 %v2805_v56, %v2878_v9  ;;  %v2895_v12 = vsel %vm1097_vm6, %v2876_v7, %v1226_v41 }
 0x1dc   : > { %v964_v49 = vpop.permute.xlu1 %963  ;;  %v1118_v26 = vadd.f32 %v2796_v31, %v2882_v11  ;;  %v1142_v23 = vadd.f32 %v2762_v6, %v2882_v11  ;;  %v1166_v40 = vadd.f32 %v2802_v48, %v2882_v11  ;;  %v1190_v30 = vadd.f32 %v2805_v56, %v2882_v11 }
 0x1dd   : > { %v980_v52 = vadd.f32 %v964_v49, %v2793_v42  ;;  %v1058_v38 = vpop.permute.xlu0 %1057  ;;  %v1320_v2 = vsel %vm1097_vm6, %v1312_v33, %v1319_v34  ;;  %v1341_v21 = vrot.slane %v1333_v57, 1  ;;  %v1201_v51 = vsel %vm1097_vm6, %v1200_v0, %v1196_v60 }
 0x1de   : > { %v2908_v14 = vadd.f32 %v1058_v38, %v979_v36  ;;  %v1127_v17 = vrot.slane %v1118_v26, 7  ;;  %v1152_v43 = vsel %vm1102_vm8, %v1142_v23, %v1151_v4  ;;  %v1321_v32 = vsel %vm1099_vm7, %v1312_v33, %v1320_v2 }
 0x1df   : > { %v1153_v15 = vsel %vm1104_vm9, %v1142_v23, %v1152_v43  ;;  %v1176_v29 = vrot.slane %v1166_v40, 1  ;;  %v1342_v19 = vsel %vm1097_vm6, %v1341_v21, %v1340_v35  ;;  %v1198_v22 = vcombine.high %v1190_v30, %v1190_v30 }
 0x1e0   : > { %v1056_v42 = vpop.permute.xlu1 %1055  ;;  %v1119_v41 = vadd.f32 %v2799_v3, %v2908_v14  ;;  %v1128_v28 = vsel %vm1102_vm8, %v1127_v17, %v1126_v50  ;;  %v1143_v60 = vadd.f32 %v2796_v31, %v2908_v14  ;;  %v1167_v36 = vadd.f32 %v2762_v6, %v2908_v14 }
 0x1e1   : > { %v2922_v46 = vadd.f32 %v1056_v42, %v2828_v55  ;;  %v1129_v59 = vsel %vm1104_vm9, %v1127_v17, %v1128_v28  ;;  %v1177_v37 = vsel %vm1102_vm8, %v1176_v29, %v1175_v62  ;;  %v1343_v24 = vsel %vm1099_vm7, %v1341_v21, %v1342_v19 }
 0x1e2   : > { %v1130_v27 = vrot.slane %v1119_v41, 6  ;;  %v1154_v1 = vrot.slane %v1143_v60, 7  ;;  %v1178_v54 = vsel %vm1104_vm9, %v1176_v29, %v1177_v37  ;;  %v1191_v50 = vadd.f32 %v2802_v48, %v2908_v14 }
 0x1e3   : > { %v1313_v8 = vadd.f32 %v2796_v31, %v2922_v46  ;;  %v1179_v45 = vsel %vm1107_vm10, %v1167_v36, %v1178_v54  ;;  %v1334_v55 = vadd.f32 %v2762_v6, %v2922_v46  ;;  %v1202_v4 = vsel %vm1099_vm7, %v1200_v0, %v1201_v51 }
 0x1e4   : > { %v1060_v34 = vpop.permute.xlu1 %1059  ;;  %v1131_v62 = vsel %vm1107_vm10, %v1130_v27, %v1129_v59  ;;  %v1155_v35 = vsel %vm1107_vm10, %v1154_v1, %v1153_v15  ;;  %v1180_v33 = vsel %vm1109_vm11, %v1167_v36, %v1179_v45  ;;  %v1199_v57 = vcombine.high %v1191_v50, %v1191_v50 }
 0x1e5   : > { %v2939_v49 = vadd.f32 %v1060_v34, %v980_v52  ;;  %v1132_v26 = vsel %vm1109_vm11, %v1130_v27, %v1131_v62  ;;  %v1156_v23 = vsel %vm1109_vm11, %v1154_v1, %v1155_v35  ;;  %v1322_v40 = vrot.slane %v1313_v8, 7 }
 0x1e6   : > { %1133 = vrot.lane.b32.xlu0 %v1132_v26, %s1873_s18  ;;  %v1344_v0 = vsel %vm1102_vm8, %v1334_v55, %v1343_v24  ;;  %v1203_v30 = vrot.slane %v1198_v22, 6  ;;  %v1206_v38 = vrot.slane %v1199_v57, 5  ;;  %v1355_v2 = vadd.f32 %v2802_v48, %v2922_v46 }
 0x1e7   : > { %v1314_v21 = vadd.f32 %v2799_v3, %v2939_v49  ;;  %v1323_v52 = vsel %vm1102_vm8, %v1322_v40, %v1321_v32  ;;  %v1335_v51 = vadd.f32 %v2796_v31, %v2939_v49  ;;  %v1345_v17 = vsel %vm1104_vm9, %v1334_v55, %v1344_v0 }
 0x1e8   : > { %v1324_v43 = vsel %vm1104_vm9, %v1322_v40, %v1323_v52  ;;  %v1204_v15 = vsel %vm1102_vm8, %v1203_v30, %v1202_v4  ;;  %v1356_v29 = vadd.f32 %v2762_v6, %v2939_v49  ;;  %v1362_v19 = vrot.slane %v2891_v58, 2 }
 0x1e9   : > { %v1325_v22 = vrot.slane %v1314_v21, 6  ;;  %v1346_v42 = vrot.slane %v1335_v51, 7  ;;  %v1205_v41 = vsel %vm1104_vm9, %v1203_v30, %v1204_v15  ;;  %v1365_v28 = vrot.slane %v1355_v2, 1 }
 0x1ea   : > { %1157 = vrot.lane.b32.xlu0 %v1156_v23, %s1874_s19  ;;  %v1207_v32 = vsel %vm1107_vm10, %v1206_v38, %v1205_v41  ;;  %v1363_v60 = vsel %vm1097_vm6, %v1362_v19, %v1361_v63  ;;  %v1216_v36 = vadd.f32 %v2808_v47, %v2882_v11  ;;  %v1217_v58 = vadd.f32 %v2805_v56, %v2908_v14 }
 0x1eb   : > { %v1326_v59 = vsel %vm1107_vm10, %v1325_v22, %v1324_v43  ;;  %v1347_v37 = vsel %vm1107_vm10, %v1346_v42, %v1345_v17  ;;  %v1208_v24 = vsel %vm1109_vm11, %v1206_v38, %v1207_v32  ;;  %v1364_v27 = vsel %vm1099_vm7, %v1362_v19, %v1363_v60 }
 0x1ec   : > { %v1327_v1 = vsel %vm1109_vm11, %v1325_v22, %v1326_v59  ;;  %v1348_v44 = vsel %vm1109_vm11, %v1346_v42, %v1347_v37  ;;  %v1366_v63 = vsel %vm1102_vm8, %v1365_v28, %v1364_v27  ;;  %v1224_v54 = vcombine.high %v1216_v36, %v1216_v36 }
 0x1ed   : > { %1328 = vrot.lane.b32.xlu1 %v1327_v1, %s1873_s18  ;;  %v1367_v50 = vsel %vm1104_vm9, %v1365_v28, %v1366_v63  ;;  %v1225_v8 = vcombine.high %v1217_v58, %v1217_v58  ;;  %v1228_v45 = vsel %vm1099_vm7, %v2876_v7, %v2895_v12  ;;  %v1374_v55 = vadd.f32 %v2811_v18, %v2856_v13 }
 0x1ee   : > { %1181 = vrot.lane.b32.xlu0 %v1180_v33, %s1875_s9  ;;  %v1368_v4 = vsel %vm1107_vm10, %v1356_v29, %v1367_v50  ;;  %v1229_v34 = vrot.slane %v1224_v54, 7  ;;  %v1375_v62 = vadd.f32 %v2808_v47, %v2878_v9  ;;  %v1376_v35 = vadd.f32 %v2805_v56, %v2922_v46 }
 0x1ef   : > { %v1369_v57 = vsel %vm1109_vm11, %v1356_v29, %v1368_v4  ;;  %v1232_v26 = vrot.slane %v1225_v8, 6  ;;  %v1377_v7 = vadd.f32 %v2802_v48, %v2939_v49  ;;  %v1382_v12 = vcombine.high %v1374_v55, %v1374_v55 }
 0x1f0   : > { %v1230_v23 = vsel %vm1102_vm8, %v1229_v34, %v1228_v45  ;;  %v1383_v40 = vcombine.high %v1375_v62, %v1375_v62  ;;  %v1384_v33 = vcombine.high %v1376_v35, %v1376_v35  ;;  %v1242_v0 = vadd.f32 %v2811_v18, %v2882_v11 }
 0x1f1   : > { %1349 = vrot.lane.b32.xlu1 %v1348_v44, %s1874_s19  ;;  %v1231_v30 = vsel %vm1104_vm9, %v1229_v34, %v1230_v23  ;;  %v1385_v38 = vcombine.high %v1377_v7, %v1377_v7  ;;  %v1243_v2 = vadd.f32 %v2808_v47, %v2908_v14  ;;  %v1249_v21 = vcombine.high %v2862_v61, %v2862_v61 }
 0x1f2   : > { %1209 = vrot.lane.b32.xlu0 %v1208_v24, %s1876_s15  ;;  %v1233_v48 = vsel %vm1107_vm10, %v1232_v26, %v1231_v30  ;;  %v1386_v52 = vrot.slane %v1383_v40, 7  ;;  %v1389_v51 = vrot.slane %v1384_v33, 6  ;;  %v1250_v17 = vcombine.high %v1242_v0, %v1242_v0 }
 0x1f3   : > { %v1234_v43 = vsel %vm1109_vm11, %v1232_v26, %v1233_v48  ;;  %v1392_v15 = vrot.slane %v1385_v38, 5  ;;  %v1251_v29 = vcombine.high %v1243_v2, %v1243_v2  ;;  %v1252_v19 = vrot.slane %v1248_v20, 2 }
 0x1f4   : > { %v1387_v22 = vsel %vm1097_vm6, %v1386_v52, %v1382_v12  ;;  %v1253_v42 = vrot.slane %v1249_v21, 1  ;;  %v1399_v61 = vadd.f32 %v2816_v10, %v2856_v13  ;;  %v1400_v41 = vadd.f32 %v2811_v18, %v2878_v9 }
 0x1f5   : > { %1370 = vrot.lane.b32.xlu1 %v1369_v57, %s1875_s9  ;;  %v1388_v28 = vsel %vm1099_vm7, %v1386_v52, %v1387_v22  ;;  %v1258_v32 = vrot.slane %v1251_v29, 7  ;;  %v1401_v60 = vadd.f32 %v2808_v47, %v2922_v46  ;;  %v1402_v16 = vadd.f32 %v2805_v56, %v2939_v49 }
 0x1f6   : > { %1235 = vrot.lane.b32.xlu0 %v1234_v43, %s1877_s20  ;;  %v1390_v20 = vsel %vm1102_vm8, %v1389_v51, %v1388_v28  ;;  %v1254_v36 = vsel %vm1097_vm6, %v1253_v42, %v1252_v19  ;;  %v1407_v58 = vcombine.high %v1399_v61, %v1399_v61  ;;  %v1408_v59 = vcombine.high %v1400_v41, %v1400_v41 }
 0x1f7   : > { %v1391_v37 = vsel %vm1104_vm9, %v1389_v51, %v1390_v20  ;;  %v1255_v24 = vsel %vm1099_vm7, %v1253_v42, %v1254_v36  ;;  %v1409_v27 = vcombine.high %v1401_v60, %v1401_v60  ;;  %v1410_v1 = vcombine.high %v1402_v16, %v1402_v16 }
 0x1f8   : > { %v1393_v44 = vsel %vm1107_vm10, %v1392_v15, %v1391_v37  ;;  %v1256_v63 = vsel %vm1102_vm8, %v1250_v17, %v1255_v24  ;;  %v1411_v56 = vrot.slane %v1407_v58, 1  ;;  %v1267_v54 = vadd.f32 %v2799_v3, %v2840_v5 }
 0x1f9   : > { %v1394_v50 = vsel %vm1109_vm11, %v1392_v15, %v1393_v44  ;;  %v1257_v8 = vsel %vm1104_vm9, %v1250_v17, %v1256_v63  ;;  %v1414_v45 = vrot.slane %v1409_v27, 7  ;;  %v1417_v55 = vrot.slane %v1410_v1, 6 }
 0x1fa   : > { %1395 = vrot.lane.b32.xlu1 %v1394_v50, %s1876_s15  ;;  %v1259_v4 = vsel %vm1107_vm10, %v1258_v32, %v1257_v8  ;;  %v1412_v34 = vsel %vm1097_vm6, %v1408_v59, %v1411_v56  ;;  %v1268_v62 = vadd.f32 %v2816_v10, %v2882_v11  ;;  %v1269_v35 = vadd.f32 %v2811_v18, %v2908_v14 }
 0x1fb   : > { %v1260_v57 = vsel %vm1109_vm11, %v1258_v32, %v1259_v4  ;;  %v1413_v26 = vsel %vm1099_vm7, %v1408_v59, %v1412_v34  ;;  %v1275_v7 = vcombine.high %v1267_v54, %v1267_v54  ;;  %v1278_v12 = vrot.slane %v1274_v53, 3 }
 0x1fc   : > { %1261 = vrot.lane.b32.xlu0 %v1260_v57, %s1878_s2  ;;  %v1415_v23 = vsel %vm1102_vm8, %v1414_v45, %v1413_v26  ;;  %v1276_v40 = vcombine.high %v1268_v62, %v1268_v62  ;;  %v1277_v33 = vcombine.high %v1269_v35, %v1269_v35  ;;  %v1424_v0 = vadd.f32 %v2799_v3, %v2856_v13 }
 0x1fd   : > { %v1416_v30 = vsel %vm1104_vm9, %v1414_v45, %v1415_v23  ;;  %v1279_v38 = vrot.slane %v1275_v7, 2  ;;  %v1425_v2 = vadd.f32 %v2816_v10, %v2878_v9  ;;  %v1426_v39 = vadd.f32 %v2811_v18, %v2922_v46 }
 0x1fe   : > { %v1418_v53 = vsel %vm1107_vm10, %v1417_v55, %v1416_v30  ;;  %v1282_v21 = vrot.slane %v1276_v40, 1  ;;  %v1427_v48 = vadd.f32 %v2808_v47, %v2939_v49  ;;  %v1432_v52 = vcombine.high %v1424_v0, %v1424_v0 }
 0x1ff   : > { %v1419_v51 = vsel %vm1109_vm11, %v1417_v55, %v1418_v53  ;;  %v1280_v17 = vsel %vm1097_vm6, %v1279_v38, %v1278_v12  ;;  %v1433_v43 = vcombine.high %v1425_v2, %v1425_v2  ;;  %v1434_v15 = vcombine.high %v1426_v39, %v1426_v39 }
 0x200   : > { %1420 = vrot.lane.b32.xlu1 %v1419_v51, %s1877_s20  ;;  %v1281_v29 = vsel %vm1099_vm7, %v1279_v38, %v1280_v17  ;;  %v1435_v19 = vcombine.high %v1427_v48, %v1427_v48  ;;  %v1436_v22 = vrot.slane %v1432_v52, 2  ;;  %v1449_v42 = vadd.f32 %v2796_v31, %v2856_v13 }
 0x201   : > { %v1283_v61 = vsel %vm1102_vm8, %v1282_v21, %v1281_v29  ;;  %v1437_v41 = vrot.slane %v1433_v43, 1  ;;  %v1450_v47 = vadd.f32 %v2799_v3, %v2878_v9  ;;  %v1451_v28 = vadd.f32 %v2816_v10, %v2922_v46 }
 0x202   : > { %v1284_v32 = vsel %vm1104_vm9, %v1282_v21, %v1283_v61  ;;  %v1442_v60 = vrot.slane %v1435_v19, 7  ;;  %v1452_v16 = vadd.f32 %v2811_v18, %v2939_v49  ;;  %v1457_v20 = vcombine.high %v1449_v42, %v1449_v42 }
 0x203   : > { %v1285_v36 = vsel %vm1107_vm10, %v1277_v33, %v1284_v32  ;;  %v1438_v58 = vsel %vm1097_vm6, %v1437_v41, %v1436_v22  ;;  %v1458_v59 = vcombine.high %v1450_v47, %v1450_v47  ;;  %v1459_v37 = vcombine.high %v1451_v28, %v1451_v28 }
 0x204   : > { %v1286_v24 = vsel %vm1109_vm11, %v1277_v33, %v1285_v36  ;;  %v1439_v27 = vsel %vm1099_vm7, %v1437_v41, %v1438_v58  ;;  %v1461_v44 = vrot.slane %v1457_v20, 3  ;;  %v1089_v54 = vadd.f32 %v2796_v31, %v2840_v5 }
 0x205   : > { %1287 = vrot.lane.b32.xlu0 %v1286_v24, %s1879_s8  ;;  %v1440_v1 = vsel %vm1102_vm8, %v1434_v15, %v1439_v27  ;;  %v1462_v63 = vrot.slane %v1458_v59, 2  ;;  %v1465_v56 = vrot.slane %v1459_v37, 1  ;;  %v1090_v50 = vadd.f32 %v2799_v3, %v2882_v11 }
 0x206   : > { %v1441_v18 = vsel %vm1104_vm9, %v1434_v15, %v1440_v1  ;;  %v1091_v8 = vadd.f32 %v2816_v10, %v2908_v14  ;;  %v1460_v55 = vcombine.high %v1452_v16, %v1452_v16  ;;  %v1088_v34 = vadd.f32 %v2762_v6, %v2813_v25  ;;  %v1475_v1 = vld [vmem:[#allocation3] sm:$0xf] }
 0x207   : > { %v1443_v45 = vsel %vm1107_vm10, %v1442_v60, %v1441_v18  ;;  %v1463_v4 = vsel %vm1097_vm6, %v1462_v63, %v1461_v44  ;;  %v1096_v57 = vrot.slane %v1089_v54, 7  ;;  %v1101_v5 = vrot.slane %v1090_v50, 6 }
 0x208   : > { %v1444_v62 = vsel %vm1109_vm11, %v1442_v60, %v1443_v45  ;;  %v1464_v35 = vsel %vm1099_vm7, %v1462_v63, %v1463_v4  ;;  %v1106_v26 = vrot.slane %v1091_v8, 5  ;;  %v1294_v14 = vadd.f32 %v2799_v3, %v2922_v46  ;;  %v1488_v63 = vld [vmem:[#allocation4] sm:$0xf] }
 0x209   : > { %1445 = vrot.lane.b32.xlu1 %v1444_v62, %s1878_s2  ;;  %v1466_v11 = vsel %vm1102_vm8, %v1465_v56, %v1464_v35  ;;  %v1098_v12 = vsel %vm1097_vm6, %v1096_v57, %v1088_v34  ;;  %v1295_v25 = vadd.f32 %v2816_v10, %v2939_v49  ;;  %v1293_v23 = vadd.f32 %v2796_v31, %v2878_v9 }
 0x20a   : > { %v1467_v7 = vsel %vm1104_vm9, %v1465_v56, %v1466_v11  ;;  %v1100_v33 = vsel %vm1099_vm7, %v1096_v57, %v1098_v12  ;;  %v1292_v0 = vadd.f32 %v2762_v6, %v2856_v13  ;;  %v1303_v30 = vrot.slane %v1294_v14, 6 }
 0x20b   : > { %v1468_v40 = vsel %vm1107_vm10, %v1460_v55, %v1467_v7  ;;  %v1103_v46 = vsel %vm1102_vm8, %v1101_v5, %v1100_v33  ;;  %v1300_v38 = vrot.slane %v1293_v23, 7  ;;  %v1306_v9 = vrot.slane %v1295_v25, 5 }
 0x20c   : > { %v1469_v3 = vsel %vm1109_vm11, %v1460_v55, %v1468_v40  ;;  %v1105_v31 = vsel %vm1104_vm9, %v1101_v5, %v1103_v46 }
 0x20d   : > { %1470 = vrot.lane.b32.xlu1 %v1469_v3, %s1879_s8  ;;  %v1108_v10 = vsel %vm1107_vm10, %v1106_v26, %v1105_v31  ;;  %v1301_v49 = vsel %vm1097_vm6, %v1300_v38, %v1292_v0 }
 0x20e   : > { %v1110_v6 = vsel %vm1109_vm11, %v1106_v26, %v1108_v10  ;;  %v1302_v13 = vsel %vm1099_vm7, %v1300_v38, %v1301_v49 }
 0x20f   : > { %1113 = vst.msk [vmem:[%s2029_s22] sm:$0xf] %vm1112_vm12, %v1110_v6  ;;  %v1304_v2 = vsel %vm1102_vm8, %v1303_v30, %v1302_v13 }
 0x210   : > { %v1305_v39 = vsel %vm1104_vm9, %v1303_v30, %v1304_v2 }
 0x211   : > { %v1307_v53 = vsel %vm1107_vm10, %v1306_v9, %v1305_v39 }
 0x212   : > { %v1308_v21 = vsel %vm1109_vm11, %v1306_v9, %v1307_v53 }
 0x213   : > { %1310 = vst.msk [vmem:[%s2029_s22 + $0x4] sm:$0xf] %vm1112_vm12, %v1308_v21 }
 0x258   : > { %v1134_v48 = vpop.permute.xlu0 %1133 }
 0x259   : > { %1137 = vst.msk [vmem:[%s2029_s22] sm:$0xf] %vm1136_vm13, %v1134_v48 }
 0x25c   : > { %v1158_v52 = vpop.permute.xlu0 %1157 }
 0x25d   : > { %1161 = vst.msk [vmem:[%s2029_s22] sm:$0xf] %vm1160_vm14, %v1158_v52 }
 0x25f   : > { %v1329_v51 = vpop.permute.xlu1 %1328 }
 0x260   : > { %1331 = vst.msk [vmem:[%s2029_s22 + $0x4] sm:$0xf] %vm1136_vm13, %v1329_v51  ;;  %v1182_v17 = vpop.permute.xlu0 %1181 }
 0x261   : > { %1185 = vst.msk [vmem:[%s2029_s22] sm:$0xf] %vm1184_vm15, %v1182_v17 }
 0x263   : > { %v1350_v43 = vpop.permute.xlu1 %1349 }
 0x264   : > { %1352 = vst.msk [vmem:[%s2029_s22 + $0x4] sm:$0xf] %vm1160_vm14, %v1350_v43  ;;  %v1210_v15 = vpop.permute.xlu0 %1209 }
 0x265   : > { %1213 = vst.msk [vmem:[%s2029_s22] sm:$0xf] %vm1212_vm0, %v1210_v15 }
 0x267   : > { %v1371_v29 = vpop.permute.xlu1 %1370 }
 0x268   : > { %1373 = vst.msk [vmem:[%s2029_s22 + $0x4] sm:$0xf] %vm1184_vm15, %v1371_v29  ;;  %v1236_v19 = vpop.permute.xlu0 %1235 }
 0x269   : > { %1239 = vst.msk [vmem:[%s2029_s22] sm:$0xf] %vm1238_vm1, %v1236_v19 }
 0x26c   : > { %v1396_v22 = vpop.permute.xlu1 %1395 }
 0x26d   : > { %1398 = vst.msk [vmem:[%s2029_s22 + $0x4] sm:$0xf] %vm1212_vm0, %v1396_v22 }
 0x26e   : > { %v1262_v42 = vpop.permute.xlu0 %1261 }
 0x26f   : > { %1265 = vst.msk [vmem:[%s2029_s22] sm:$0xf] %vm1264_vm2, %v1262_v42 }
 0x272   : > { %v1421_v61 = vpop.permute.xlu1 %1420 }
 0x273   : > { %1423 = vst.msk [vmem:[%s2029_s22 + $0x4] sm:$0xf] %vm1238_vm1, %v1421_v61 }
 0x277   : > { %v1288_v41 = vpop.permute.xlu0 %1287 }
 0x278   : > { %1291 = vst.msk [vmem:[%s2029_s22] sm:$0xf] %vm1290_vm3, %v1288_v41 }
 0x27b   : > { %v1446_v47 = vpop.permute.xlu1 %1445 }
 0x27c   : > { %1448 = vst.msk [vmem:[%s2029_s22 + $0x4] sm:$0xf] %vm1264_vm2, %v1446_v47 }
 0x27f   : > { %v1471_v28 = vpop.permute.xlu1 %1470 }
 0x280   : > { %1473 = vst.msk [vmem:[%s2029_s22 + $0x4] sm:$0xf] %vm1290_vm3, %v1471_v28 }
 0x287   : > { %v1474_v32 = vld [vmem:[%s2029_s22] sm:$0xff] }
 0x288   : > { %v1477_v60 = vcombine.high %v1474_v32, %v1474_v32  ;;  %v1489_v16 = vmul.f32 %v1474_v32, %v1474_v32  ;;  %v1480_v20 = vsel %vm1479_vm4, %v1474_v32, 0.0 }
 0x28a   : > { %v1481_v36 = vsel %vm1479_vm4, %v1477_v60, 0.0  ;;  %v1491_v58 = vcombine.high %v1489_v16, %v1489_v16  ;;  %v1493_v37 = vsel %vm1479_vm4, %v1489_v16, 0.0 }
 0x28b   : > { %v1482_v59 = vadd.f32 %v1481_v36, %v1480_v20 }
 0x28c   : > { %v1494_v24 = vsel %vm1479_vm4, %v1491_v58, 0.0 }
 0x28d   : > { %1483 = vadd.xlane.f32.xlu0 %v1482_v59  ;;  %v1495_v27 = vadd.f32 %v1494_v24, %v1493_v37 }
 0x28f   : > { %1496 = vadd.xlane.f32.xlu1 %v1495_v27 }
 0x316   : > { %v1484_v44 = vpop.xlane.xlu0 %1483 }
 0x317   : > { %v1485_v56 = vadd.f32 %v1484_v44, %v1475_v1  ;;  %1503 = sbr.rel (%p1627_p12) target bundleno = 832 (0x340), region = 52 }
 0x318   : > { %v1497_v18 = vpop.xlane.xlu1 %1496 }
 0x319   : > { %1487 = vst.msk [vmem:[#allocation3] sm:$0xf] %vm1486_vm5, %v1485_v56  ;;  %v1498_v54 = vadd.f32 %v1497_v18, %v1488_v63 }
 0x31b   : > { %1499 = vst.msk [vmem:[#allocation4] sm:$0xf] %vm1486_vm5, %v1498_v54 }
 0x31c   : > { %v1511_v57 = vld [vmem:[%s3184_s3] sm:$0xf] }
 0x31d   : > { %v1516_v26 = vld [vmem:[%s3185_s4] sm:$0xf] }
 0x320   : > { %v1504_v50 = vld [vmem:[#allocation3] sm:$0xf] }
 0x321   : > { %v1505_v45 = vmul.f32 0.001953125, %v1504_v50 }
 0x322   : > { %v1506_v8 = vld [vmem:[#allocation4] sm:$0xf] }
 0x323   : > { %v1507_v55 = vmul.f32 0.001953125, %v1506_v8  ;;  %v1508_v4 = vmul.f32 %v1505_v45, %v1505_v45 }
 0x325   : > { %v1509_v34 = vsub.f32 %v1507_v55, %v1508_v4 }
 0x327   : > { %v1510_v62 = vmax.f32 %v1509_v34, 0.0 }
 0x329   : > { %v1512_v35 = vadd.f32 1e-05, %v1510_v62 }
 0x32b   : > { %1769 = vrsqrt.f32 %v1512_v35 }
 0x338   : > { %v1770_v5 = vpop.eup %1769 }
 0x339   : > { %v1514_v11 = vmul.f32 %v1770_v5, %v1511_v57 }
 0x33b   : > { %1515 = vst.msk [vmem:[%s3187_s6] sm:$0xf] %vm1486_vm5, %v1514_v11  ;;  %v1517_v14 = vmul.f32 %v1514_v11, %v1505_v45 }
 0x33d   : > { %v1518_v7 = vsub.f32 %v1516_v26, %v1517_v14 }
 0x33f   : > { %1519 = vst.msk [vmem:[%s3188_s7] sm:$0xf] %vm1486_vm5, %v1518_v7 }
 0x340 PF: > { %s1634_s18 = sshll.u32 %s1942_s28, 7  ;;  %s1535_s20 = sshll.u32 %s2029_s22, 4  ;;  %s1536_s20 = int_to_ptr.vmem [resolvable:$true] %s1535_s20 }
 0x341   : > { %s1533_s15 = scalar_lea.hbm %s3186_s5, %s1634_s18  ;;  %s1521_s2 = scalar_lea.sflag [#allocation7], %s2018_s17 }
 0x342   : > { %s1799_s8 = scalar_lea.vmem %s1536_s20, 128  ;;  %p3325_p4 = scmp.ne.s32.totalorder %s3221_s13, 0 }
 0x343   : > { %p1800_p13 = scmp.ne.s32.totalorder %s1536_s20, %s1799_s8  ;;  %s1880_s29 = smov [#allocation8]  }
 0x344   : > { %s1803_s16 = sshll.u32 %s1880_s29, 4  ;;  %s1804_s16 = int_to_ptr.vmem [resolvable:$false] %s1803_s16 }
 0x345   : > { %p1801_p5 = pnand %p1800_p13, %p3325_p4  ;;  %s1805_s23 = scalar_lea.vmem %s1804_s16, 256 }
 0x346   : > { %p1806_p8 = scmp.lt.s32.totalorder %s1536_s20, %s1804_s16  ;;  %p1807_p10 = scmp.lt.s32.totalorder %s1805_s23, %s1799_s8 }
 0x347   : > { %p1802_p7 = pneg %p1801_p5 }
 0x348   : > { %p1808_p0 = por %p1807_p10, %p1806_p8 }
 0x34a   : > { %p1809_p2 = pnand %p1808_p0, %p1802_p7 }
 0x34c   : > { %1812 = shalt.err (!%p1809_p2)
}
 0x34d   : > { %s1813_s28 = scalar_lea.hbm %s1533_s15, 128  ;;  %s1817_s0 = scalar_lea.hbm %s3186_s5, 256 }
 0x34e   : > { %p1814_p9 = scmp.ne.s32.totalorder %s1533_s15, %s1813_s28  ;;  %p1818_p6 = scmp.lt.s32.totalorder %s1533_s15, %s3186_s5 }
 0x34f   : > { %p1819_p11 = scmp.lt.s32.totalorder %s1817_s0, %s1813_s28 }
 0x350   : > { %p1815_p1 = pnand %p1814_p9, %p3325_p4 }
 0x351   : > { %p1820_p12 = por %p1819_p11, %p1818_p6 }
 0x352   : > { %p1816_p3 = pneg %p1815_p1 }
 0x354   : > { %p1821_p13 = pnand %p1820_p12, %p1816_p3 }
 0x356   : > { %1824 = shalt.err (!%p1821_p13)
}
 0x357   : > { %1709 = dma.vmem_to_hbm [thread:$0]  (%p3325_p4), %s1536_s20, 128, %s1533_s15, %s1521_s2  }
 0x358 PF: > { %s1559_s12 = sand.u32 1, %s1851_s24   ;;  %p3326_p5 = scmp.ne.s32.totalorder %s3222_s14, 0 }
 0x359   : > { %p3327_p7 = scmp.ge.s32.totalorder %s1863_s27, 2  ;;  %s1560_s21 = scalar_lea.sflag [#allocation7], %s1559_s12 }
 0x35b   : > { %p1716_p8 = pnand %p3327_p7, %p3326_p5 }
 0x35d   : > { %p1717_p10 = pneg %p1716_p8 }
 0x35f   : > { %1846 = dma.done.wait (%p1717_p10), %s1560_s21, 128  }
 0x360   : > { %1848 = vsyncadd (%p1717_p10), %s1560_s21, 4294967168  ;;  %p21_p0 = scmp.ge.s32.totalorder %s1946_s30, 4   ;;  %s3328_s24 = smov %s1855_s25 }
 0x361   : > { %s3329_s25 = smov %s1859_s26  ;;  %s3330_s26 = smov %s1958_s10 }
 0x362   : > { %s3331_s27 = smov %s1946_s30  ;;  %23 = sbr.rel (!%p21_p0) target bundleno = 9 (0x9), region = 109 }
 0x367   :  { %1565 = vsyncpa [#allocation6], 1 }
 0x368   :  { %1567 = vsyncpa [#allocation6 + $0x1], 1 }
 0x369   :  { %1568 = vsyncpa [#allocation7], 1 }
 0x36a   :  { %1570 = vsyncpa [#allocation7 + $0x1], 1 }

</bundles_post_ra>
